<compile_context>
chip_gen: v7x
topology: tpu7x:2x2x1
jax: 0.10.0
libtpu: 0.0.40
codegen_flags: <defaults>
</compile_context>

<pallas_src>
import functools
import numpy as np

import jax
import jax.numpy as jnp
from jax import lax
from jax.experimental import pallas as pl
from jax.experimental.pallas import tpu as pltpu

EPS = 1e-5
LANE = 128     # all channel dims are zero-padded to this lane width
COL0 = 8       # 8-aligned column where the conv halo interior starts


# ------------------------------ small helpers ------------------------------

def _round_up(x, m):
    return (x + m - 1) // m * m


def _cp(sem):
    # No hard-coded vmem_limit_bytes: blocks here are small and the scoped
    # default is safe on v5e/v6e (128 MiB) and v7x (64 MiB) alike.
    return pltpu.CompilerParams(dimension_semantics=sem)


def _row_tile(p, max_rows):
    """Full array if it fits, else the largest multiple of 8 <= max_rows.
    Grids use pl.cdiv, so p need NOT divide the tile; the ragged last tile is
    masked in the stats kernels and store-masked for outputs."""
    if p <= max_rows:
        return p
    return max(8, (max_rows // 8) * 8)


# ------------------------------ Pallas kernels ------------------------------

def _conv1_stats_kernel(x_ref, w_ref, st_ref, *, rows_total, tile_rows):
    """BN1 pass 1/2: y = x @ w1 (shuffle folded); accumulate global sum/sumsq
    into the (2, C) output block that stays resident across the grid."""
    i = pl.program_id(0)

    @pl.when(i == 0)
    def _():
        st_ref[...] = jnp.zeros_like(st_ref)

    y = jnp.dot(x_ref[...], w_ref[...], preferred_element_type=jnp.float32)
    row = lax.broadcasted_iota(jnp.int32, (tile_rows, 1), 0) + i * tile_rows
    y = jnp.where(row < rows_total, y, 0.0)            # mask ragged last tile
    s = jnp.sum(y, axis=0, keepdims=True)
    sq = jnp.sum(y * y, axis=0, keepdims=True)
    st_ref[...] += jnp.concatenate([s, sq], axis=0)    # one combined update


def _conv3_stats_kernel(d_ref, sc_ref, sh_ref, w_ref, st_ref, *,
                        rows_total, tile_rows):
    """BN3 pass 1/2: h = relu(BN2(d)); z = h @ w3; accumulate sum/sumsq."""
    i = pl.program_id(0)

    @pl.when(i == 0)
    def _():
        st_ref[...] = jnp.zeros_like(st_ref)

    h = jnp.maximum(d_ref[...].astype(jnp.float32) * sc_ref[...] + sh_ref[...],
                    0.0)
    z = jnp.dot(h, w_ref[...], preferred_element_type=jnp.float32)
    row = lax.broadcasted_iota(jnp.int32, (tile_rows, 1), 0) + i * tile_rows
    z = jnp.where(row < rows_total, z, 0.0)
    s = jnp.sum(z, axis=0, keepdims=True)
    sq = jnp.sum(z * z, axis=0, keepdims=True)
    st_ref[...] += jnp.concatenate([s, sq], axis=0)


def _dw_bn_kernel(x_ref, w1_ref, sc1_ref, sh1_ref, w2_ref, d_ref, st_ref,
                  pad_ref, *full_scr, H, W, stride):
    """Per-image fused stage 2:
       conv1 (1x1, shuffle folded) recomputed from x -> BN1 affine -> ReLU
       -> VMEM halo (interior at an 8-aligned column) -> 3x3 depthwise conv
       (stride-2 via one strided copy-out) -> bf16 output + f32 BN2 partials.
    y1 never round-trips through HBM."""
    Cm = w1_ref.shape[1]
    Ho = (H + 1) // 2 if stride == 2 else H
    Wo = (W + 1) // 2 if stride == 2 else W

    h = jnp.dot(x_ref[...], w1_ref[...], preferred_element_type=jnp.float32)
    h = jnp.maximum(h * sc1_ref[...] + sh1_ref[...], 0.0)          # (H*W, Cm)

    # Zero the halo scratch once; the border stays zero afterwards because only
    # the interior is rewritten (grid axis is "arbitrary", so step 0 runs first
    # on the core that owns this scratch -- safe on megacore parts too).
    @pl.when(pl.program_id(0) == 0)
    def _():
        pad_ref[...] = jnp.zeros_like(pad_ref)
    for r in range(H):                           # 8-aligned interior stores
        pad_ref[1 + r, COL0:COL0 + W, :] = h[r * W:(r + 1) * W, :]

    # 3x3 depthwise conv, stride 1, contiguous taps from the padded scratch.
    acc = jnp.zeros((H, W, Cm), jnp.float32)
    for dh in range(3):
        for dw in range(3):
            tap = pad_ref[dh:dh + H, COL0 - 1 + dw:COL0 - 1 + dw + W, :]
            wk = w2_ref[3 * dh + dw:3 * dh + dw + 1, :].reshape(1, 1, Cm)
            acc = acc + tap * wk

    if stride == 1:
        out = acc
    else:
        full_ref = full_scr[0]
        full_ref[...] = acc                       # single strided copy-out
        out = full_ref[pl.ds(0, Ho, 2), pl.ds(0, Wo, 2), :]

    d_ref[0] = out.astype(d_ref.dtype)            # bf16 inter-stage activation

    s = jnp.sum(jnp.sum(out, axis=0, keepdims=True), axis=1, keepdims=True)
    sq = jnp.sum(jnp.sum(out * out, axis=0, keepdims=True), axis=1,
                 keepdims=True)
    st_ref[0] = jnp.concatenate([s.reshape(1, Cm), sq.reshape(1, Cm)], axis=0)


def _out_s1_kernel(d_ref, x_ref, sc2_ref, sh2_ref, w3_ref, sc3_ref, sh3_ref,
                   o_ref):
    """Stride-1 stage 4: recompute conv3 from d, BN3 normalize, +residual, ReLU."""
    h = jnp.maximum(d_ref[...].astype(jnp.float32) * sc2_ref[...] + sh2_ref[...],
                    0.0)
    z = jnp.dot(h, w3_ref[...], preferred_element_type=jnp.float32)
    o_ref[...] = jnp.maximum(z * sc3_ref[...] + sh3_ref[...] + x_ref[...], 0.0)


def _out_s2_kernel(x_ref, d_ref, sc2_ref, sh2_ref, w3_ref, sc3_ref, sh3_ref,
                   o_ref, pad_ref, full_ref, *, H, W):
    """Stride-2 stage 4 (per image): main branch (BN2+ReLU -> conv3 -> BN3 ->
    ReLU) into channels [0, Cout_p) and the AvgPool2d(3,2,1)+ReLU shortcut into
    channels [Cout_p, Cout_p+Cin_p) of one output block (in-place concat)."""
    Cin = x_ref.shape[-1]
    Cout = w3_ref.shape[1]
    Ho = (H + 1) // 2
    Wo = (W + 1) // 2

    # main branch (flat [Ho*Wo, C]; conv3 recomputed, z never stored to HBM)
    h = jnp.maximum(d_ref[...].astype(jnp.float32) * sc2_ref[...] + sh2_ref[...],
                    0.0)
    z = jnp.dot(h, w3_ref[...], preferred_element_type=jnp.float32)
    o_ref[:, 0:Cout] = jnp.maximum(z * sc3_ref[...] + sh3_ref[...], 0.0)

    # shortcut: AvgPool2d(3, stride=2, padding=1), halo in VMEM scratch
    @pl.when(pl.program_id(0) == 0)
    def _():
        pad_ref[...] = jnp.zeros_like(pad_ref)
    pad_ref[1:H + 1, COL0:COL0 + W, :] = x_ref[0]     # 8-aligned interior store

    acc = jnp.zeros((H, W, Cin), jnp.float32)
    for dh in range(3):
        for dw in range(3):
            acc = acc + pad_ref[dh:dh + H, COL0 - 1 + dw:COL0 - 1 + dw + W, :]
    full_ref[...] = acc
    pooled = jnp.maximum(
        full_ref[pl.ds(0, Ho, 2), pl.ds(0, Wo, 2), :] * (1.0 / 9.0), 0.0)
    for r in range(Ho):
        o_ref[pl.ds(r * Wo, Wo), Cout:Cout + Cin] = pooled[r]


# ------------------------- parameters (host-side prep) ----------------------

def init_params(key, in_planes, out_planes, groups):
    mid = out_planes // 4
    groups1 = 1 if in_planes == 24 else groups
    ks = jax.random.split(key, 9)

    def w_init(k, shape, fan_in):
        bound = 1.0 / float(np.sqrt(fan_in))
        return jax.random.uniform(k, shape, jnp.float32, -bound, bound)

    params = {
        "w1": w_init(ks[0], (mid, in_planes // groups1, 1, 1), in_planes // groups1),
        "g1": 1.0 + 0.1 * jax.random.normal(ks[1], (mid,), jnp.float32),
        "b1": 0.1 * jax.random.normal(ks[2], (mid,), jnp.float32),
        "w2": w_init(ks[3], (mid, 1, 3, 3), 9),
        "g2": 1.0 + 0.1 * jax.random.normal(ks[4], (mid,), jnp.float32),
        "b2": 0.1 * jax.random.normal(ks[5], (mid,), jnp.float32),
        "w3": w_init(ks[6], (out_planes, mid // groups, 1, 1), mid // groups),
        "g3": 1.0 + 0.1 * jax.random.normal(ks[7], (out_planes,), jnp.float32),
        "b3": 0.1 * jax.random.normal(ks[8], (out_planes,), jnp.float32),
    }
    return params, groups1


def _group_pw_dense(w, groups):
    """torch grouped 1x1 conv weight [Cout, Cin//g, 1, 1] -> dense [Cin, Cout]."""
    wn = np.asarray(w)[:, :, 0, 0]
    cout, cin_g = wn.shape
    cout_g = cout // groups
    cin = cin_g * groups
    dense = np.zeros((cin, cout), np.float32)
    for g in range(groups):
        dense[g * cin_g:(g + 1) * cin_g, g * cout_g:(g + 1) * cout_g] = \
            wn[g * cout_g:(g + 1) * cout_g].T
    return dense


def _shuffle_perm(c, groups):
    # output channel c' reads input channel perm[c']  (exactly torch's shuffle)
    return np.arange(c).reshape(groups, c // groups).T.reshape(-1)


def _pad_np(a, shape):
    out = np.zeros(shape, np.float32)
    out[tuple(slice(0, s) for s in a.shape)] = np.asarray(a, np.float32)
    return out


def prepare_params(params, in_planes, groups1, groups3, lane=LANE):
    """One-time host-side weight prep: grouped 1x1 convs as block-diagonal dense
    weights, channel shuffle folded into conv1's output order, and every channel
    dim zero-padded to the 128-lane width (padded BN gammas are zero, so padded
    channels stay exactly zero end-to-end)."""
    mid = int(params["w2"].shape[0])
    out_planes = int(params["w3"].shape[0])
    cin_p = _round_up(in_planes, lane)
    mid_p = _round_up(mid, lane)
    cout_p = _round_up(out_planes, lane)

    perm = _shuffle_perm(mid, groups1)
    w1d = _group_pw_dense(params["w1"], groups1)[:, perm]        # shuffle folded
    w2k = np.asarray(params["w2"])[:, 0].reshape(mid, 9).T       # (9, mid)
    w3d = _group_pw_dense(params["w3"], groups3)

    def pad1(v, n):
        return jnp.asarray(_pad_np(v, (n,)))

    return {
        "w1d": jnp.asarray(_pad_np(w1d, (cin_p, mid_p))),
        "g1": pad1(np.asarray(params["g1"])[perm], mid_p),
        "b1": pad1(np.asarray(params["b1"])[perm], mid_p),
        "w2k": jnp.asarray(_pad_np(w2k, (9, mid_p))),
        "g2": pad1(params["g2"], mid_p), "b2": pad1(params["b2"], mid_p),
        "w3d": jnp.asarray(_pad_np(w3d, (mid_p, cout_p))),
        "g3": pad1(params["g3"], cout_p), "b3": pad1(params["b3"], cout_p),
    }


def _bn_affine(stats, gamma, beta, count):
    """(2, C) global (sum, sumsq) -> exact training-mode BN scale/shift."""
    mean = stats[0] / count
    var = jnp.maximum(stats[1] / count - mean * mean, 0.0)
    # TODO(synk): use a mean-shifted sum-of-squares at production scales to
    # avoid E[x^2]-E[x]^2 cancellation.
    scale = gamma * lax.rsqrt(var + EPS)
    shift = beta - mean * scale
    return scale.reshape(1, -1), shift.reshape(1, -1)


# -------------------------------- forward pass ------------------------------

def bottleneck_pallas(x_nchw, prep, out_planes, stride, max_rows=512):
    f32 = jnp.float32
    cin_p = prep["w1d"].shape[0]
    mid_p = prep["w1d"].shape[1]
    cout_p = prep["w3d"].shape[1]

    x = jnp.transpose(x_nchw, (0, 2, 3, 1)).astype(f32)    # NCHW -> NHWC
    N, H, W, cin = x.shape
    if cin_p > cin:                                         # lane-pad channels
        x = jnp.pad(x, ((0, 0), (0, 0), (0, 0), (0, cin_p - cin)))
    P1 = N * H * W
    x2d = x.reshape(P1, cin_p)
    assert (H * W) % 8 == 0 or N == 1, "per-image flat blocks need H*W % 8 == 0"
    if stride == 1:
        assert cin == out_planes, "stride-1 residual requires in == out planes"

    # ---- stage 1: conv1 (grouped 1x1, shuffle folded) -> BN1 stats (pass 1/2)
    t1 = _row_tile(P1, max_rows)
    st1 = pl.pallas_call(
        functools.partial(_conv1_stats_kernel, rows_total=P1, tile_rows=t1),
        out_shape=jax.ShapeDtypeStruct((2, mid_p), f32),
        grid=(pl.cdiv(P1, t1),),
        in_specs=[pl.BlockSpec((t1, cin_p), lambda i: (i, 0)),
                  pl.BlockSpec((cin_p, mid_p), lambda i: (0, 0))],
        out_specs=pl.BlockSpec((2, mid_p), lambda i: (0, 0)),
        compiler_params=_cp(("arbitrary",)),
    )(x2d, prep["w1d"])
    sc1, sh1 = _bn_affine(st1, prep["g1"], prep["b1"], P1)

    # ---- stage 2: conv1 recompute + BN1 + ReLU + depthwise 3x3 + BN2 stats
    Ho = (H + 1) // 2 if stride == 2 else H
    Wo = (W + 1) // 2 if stride == 2 else W
    P2 = N * Ho * Wo
    Wp = _round_up(W + COL0 + 1, 8)
    dw_scratch = [pltpu.VMEM((H + 2, Wp, mid_p), f32)]
    if stride == 2:
        dw_scratch.append(pltpu.VMEM((H, W, mid_p), f32))
    d, st2 = pl.pallas_call(
        functools.partial(_dw_bn_kernel, H=H, W=W, stride=stride),
        out_shape=(jax.ShapeDtypeStruct((N, Ho, Wo, mid_p), jnp.bfloat16),
                   jax.ShapeDtypeStruct((N, 2, mid_p), f32)),
        grid=(N,),
        in_specs=[pl.BlockSpec((H * W, cin_p), lambda n: (n, 0)),
                  pl.BlockSpec((cin_p, mid_p), lambda n: (0, 0)),
                  pl.BlockSpec((1, mid_p), lambda n: (0, 0)),
                  pl.BlockSpec((1, mid_p), lambda n: (0, 0)),
                  pl.BlockSpec((9, mid_p), lambda n: (0, 0))],
        out_specs=(pl.BlockSpec((1, Ho, Wo, mid_p), lambda n: (n, 0, 0, 0)),
                   pl.BlockSpec((1, 2, mid_p), lambda n: (n, 0, 0))),
        scratch_shapes=dw_scratch,
        compiler_params=_cp(("arbitrary",)),   # zero-once halo scratch
    )(x2d, prep["w1d"], sc1, sh1, prep["w2k"])
    sc2, sh2 = _bn_affine(jnp.sum(st2, axis=0), prep["g2"], prep["b2"], P2)

    d2 = d.reshape(P2, mid_p)   # free row-major collapse of the HBM layout

    # ---- stage 3: BN2+ReLU -> conv3 (grouped 1x1) -> BN3 stats (pass 1/2)
    t2 = _row_tile(P2, max_rows)
    nt2 = pl.cdiv(P2, t2)
    st3 = pl.pallas_call(
        functools.partial(_conv3_stats_kernel, rows_total=P2, tile_rows=t2),
        out_shape=jax.ShapeDtypeStruct((2, cout_p), f32),
        grid=(nt2,),
        in_specs=[pl.BlockSpec((t2, mid_p), lambda i: (i, 0)),
                  pl.BlockSpec((1, mid_p), lambda i: (0, 0)),
                  pl.BlockSpec((1, mid_p), lambda i: (0, 0)),
                  pl.BlockSpec((mid_p, cout_p), lambda i: (0, 0))],
        out_specs=pl.BlockSpec((2, cout_p), lambda i: (0, 0)),
        compiler_params=_cp(("arbitrary",)),
    )(d2, sc2, sh2, prep["w3d"])
    sc3, sh3 = _bn_affine(st3, prep["g3"], prep["b3"], P2)

    # ---- stage 4: conv3 recompute + BN3 normalize + residual/shortcut + ReLU
    if stride == 1:
        out2d = pl.pallas_call(
            _out_s1_kernel,
            out_shape=jax.ShapeDtypeStruct((P2, cout_p), f32),
            grid=(nt2,),
            in_specs=[pl.BlockSpec((t2, mid_p), lambda i: (i, 0)),
                      pl.BlockSpec((t2, cin_p), lambda i: (i, 0)),
                      pl.BlockSpec((1, mid_p), lambda i: (0, 0)),
                      pl.BlockSpec((1, mid_p), lambda i: (0, 0)),
                      pl.BlockSpec((mid_p, cout_p), lambda i: (0, 0)),
                      pl.BlockSpec((1, cout_p), lambda i: (0, 0)),
                      pl.BlockSpec((1, cout_p), lambda i: (0, 0))],
            out_specs=pl.BlockSpec((t2, cout_p), lambda i: (i, 0)),
            compiler_params=_cp(("parallel",)),
        )(d2, x2d, sc2, sh2, prep["w3d"], sc3, sh3)
        out = out2d.reshape(N, Ho, Wo, cout_p)[..., :out_planes]
    else:
        assert (Ho * Wo) % 8 == 0 or N == 1
        ctot_p = cout_p + cin_p
        out2d = pl.pallas_call(
            functools.partial(_out_s2_kernel, H=H, W=W),
            out_shape=jax.ShapeDtypeStruct((P2, ctot_p), f32),
            grid=(N,),
            in_specs=[pl.BlockSpec((1, H, W, cin_p), lambda n: (n, 0, 0, 0)),
                      pl.BlockSpec((Ho * Wo, mid_p), lambda n: (n, 0)),
                      pl.BlockSpec((1, mid_p), lambda n: (0, 0)),
                      pl.BlockSpec((1, mid_p), lambda n: (0, 0)),
                      pl.BlockSpec((mid_p, cout_p), lambda n: (0, 0)),
                      pl.BlockSpec((1, cout_p), lambda n: (0, 0)),
                      pl.BlockSpec((1, cout_p), lambda n: (0, 0))],
            out_specs=pl.BlockSpec((Ho * Wo, ctot_p), lambda n: (n, 0)),
            scratch_shapes=[pltpu.VMEM((H + 2, Wp, cin_p), f32),
                            pltpu.VMEM((H, W, cin_p), f32)],
            compiler_params=_cp(("arbitrary",)),
        )(x, d2, sc2, sh2, prep["w3d"], sc3, sh3)
        out4 = out2d.reshape(N, Ho, Wo, ctot_p)
        out = jnp.concatenate([out4[..., :out_planes],
                               out4[..., cout_p:cout_p + cin]], axis=-1)

    return jnp.transpose(out, (0, 3, 1, 2))   # NHWC -> NCHW (module interface)


# ------------------------- pure-JAX reference (NCHW) ------------------------

def _bn_train_ref(x, gamma, beta):
    mean = jnp.mean(x, axis=(0, 2, 3), keepdims=True)
    var = jnp.mean((x - mean) ** 2, axis=(0, 2, 3), keepdims=True)
    return (x - mean) * lax.rsqrt(var + EPS) * gamma[None, :, None, None] \
        + beta[None, :, None, None]


def bottleneck_ref(x, p, stride, groups1, groups3):
    dn = ("NCHW", "OIHW", "NCHW")
    hp = lax.Precision.HIGHEST
    y = lax.conv_general_dilated(x, p["w1"], (1, 1), "VALID",
                                 dimension_numbers=dn, feature_group_count=groups1,
                                 precision=hp)
    y = jax.nn.relu(_bn_train_ref(y, p["g1"], p["b1"]))
    N, C, H, W = y.shape
    y = y.reshape(N, groups1, C // groups1, H, W).transpose(0, 2, 1, 3, 4).reshape(N, C, H, W)
    y = lax.conv_general_dilated(y, p["w2"], (stride, stride), ((1, 1), (1, 1)),
                                 dimension_numbers=dn, feature_group_count=C,
                                 precision=hp)
    y = jax.nn.relu(_bn_train_ref(y, p["g2"], p["b2"]))
    y = lax.conv_general_dilated(y, p["w3"], (1, 1), "VALID",
                                 dimension_numbers=dn, feature_group_count=groups3,
                                 precision=hp)
    y = _bn_train_ref(y, p["g3"], p["b3"])
    if stride == 2:
        res = lax.reduce_window(x, 0.0, lax.add, (1, 1, 3, 3), (1, 1, 2, 2),
                                ((0, 0), (0, 0), (1, 1), (1, 1))) / 9.0
        out = jax.nn.relu(jnp.concatenate([y, res], axis=1))
    else:
        out = jax.nn.relu(y + x)
    return out


# ----------------------------------- main ------------------------------------

if __name__ == "__main__":
    fwd = jax.jit(bottleneck_pallas,
                  static_argnames=("out_planes", "stride", "max_rows"))

    configs = [
        # stride=1 residual-add branch (in_planes must equal out_planes)
        dict(in_planes=16, out_planes=16, stride=1, groups=2, shape=(2, 16, 8, 8)),
        # stride=2 avg-pool shortcut + in-place concat branch
        dict(in_planes=8, out_planes=16, stride=2, groups=2, shape=(2, 8, 8, 8)),
    ]
    for cfg in configs:
        key = jax.random.PRNGKey(0)
        params, groups1 = init_params(key, cfg["in_planes"], cfg["out_planes"],
                                      cfg["groups"])
        prep = prepare_params(params, cfg["in_planes"], groups1, cfg["groups"])
        x = jax.random.normal(jax.random.fold_in(key, 7), cfg["shape"], jnp.float32)

        # max_rows=24 forces a multi-tile grid with a ragged (masked) last tile,
        # exercising the hardened cdiv/mask path even at these demo shapes.
        out = jax.block_until_ready(
            fwd(x, prep, out_planes=cfg["out_planes"], stride=cfg["stride"],
                max_rows=24))
        ref = jax.block_until_ready(
            bottleneck_ref(x, params, cfg["stride"], groups1, cfg["groups"]))

        assert out.shape == ref.shape, (out.shape, ref.shape)
        max_err = float(jnp.max(jnp.abs(out - ref)))
        # tolerance sized for the bf16 inter-stage activation storage
        assert bool(jnp.allclose(out, ref, rtol=3e-2, atol=3e-2)), max_err

    print("KERNEL_OK")
</pallas_src>

<mosaic_0001>
module attributes {stable_mosaic.version = 11 : i64} {
  func.func @_conv1_stats_kernel(%arg0: i32, %arg1: memref<24x128xf32, #tpu.memory_space<vmem>>, %arg2: memref<128x128xf32, #tpu.memory_space<vmem>>, %arg3: memref<2x128xf32, #tpu.memory_space<vmem>>) attributes {dimension_semantics = [#tpu.dimension_semantics<arbitrary>], iteration_bounds = array<i64: 6>, scalar_prefetch = 0 : i64, scratch_operands = 0 : i64, tpu.core_type = #tpu.core_type<tc>, window_params = [{transform_indices = @transform_0, window_bounds = array<i64: 24, 128>}, {pipeline_mode = #tpu.pipeline_mode<synchronous>, transform_indices = @transform_1, window_bounds = array<i64: 128, 128>}, {pipeline_mode = #tpu.pipeline_mode<synchronous>, transform_indices = @transform_2, window_bounds = array<i64: 2, 128>}]} {
    %c0_i32 = arith.constant 0 : i32
    %0 = arith.cmpi eq, %arg0, %c0_i32 : i32
    %1 = arith.extui %0 : i1 to i32
    %c0_i32_0 = arith.constant 0 : i32
    %2 = arith.cmpi ne, %1, %c0_i32_0 : i32
    scf.if %2 {
      %cst_11 = arith.constant 0.000000e+00 : f32
      %25 = vector.broadcast %cst_11 : f32 to vector<2x128xf32>
      %c0_12 = arith.constant 0 : index
      %c0_13 = arith.constant 0 : index
      %26 = vector.load %arg3[%c0_12, %c0_13] : memref<2x128xf32, #tpu.memory_space<vmem>>, vector<2x128xf32>
      tpu.vector_store %arg3[%c0_12, %c0_13], %25 {strides = array<i32>} : memref<2x128xf32, #tpu.memory_space<vmem>>, vector<2x128xf32>,
    } else {
    }
    %c0 = arith.constant 0 : index
    %c0_1 = arith.constant 0 : index
    %3 = vector.load %arg1[%c0, %c0_1] : memref<24x128xf32, #tpu.memory_space<vmem>>, vector<24x128xf32>
    %c0_2 = arith.constant 0 : index
    %c0_3 = arith.constant 0 : index
    %4 = vector.load %arg2[%c0_2, %c0_3] : memref<128x128xf32, #tpu.memory_space<vmem>>, vector<128x128xf32>
    %cst = arith.constant dense<0.000000e+00> : vector<24x128xf32>
    %5 = tpu.matmul %3, %4, %cst {dimension_numbers = #tpu.dot_dimension_numbers<[1], [0], [0], [1], [0, 0, 1, 1], [], []>} : vector<24x128xf32>, vector<128x128xf32>, vector<24x128xf32> -> vector<24x128xf32>
    %6 = tpu.iota {dimensions = array<i32: 0>} : vector<24x1xi32>
    %c24_i32 = arith.constant 24 : i32
    %7 = arith.muli %arg0, %c24_i32 : i32
    %8 = vector.broadcast %7 : i32 to vector<24x1xi32>
    %9 = arith.addi %6, %8 : vector<24x1xi32>
    %c128_i32 = arith.constant 128 : i32
    %10 = vector.broadcast %c128_i32 : i32 to vector<24x1xi32>
    %11 = arith.cmpi slt, %9, %10 : vector<24x1xi32>
    %cst_4 = arith.constant 0.000000e+00 : f32
    %12 = vector.shape_cast %11 : vector<24x1xi1> to vector<24x1xi1>
    %13 = vector.broadcast %12 : vector<24x1xi1> to vector<24x128xi1>
    %14 = vector.broadcast %cst_4 : f32 to vector<24x128xf32>
    %15 = arith.select %13, %5, %14 : vector<24x128xi1>, vector<24x128xf32>
    %cst_5 = arith.constant dense<0.000000e+00> : vector<128xf32>
    %16 = vector.multi_reduction <add>, %15, %cst_5 [0] : vector<24x128xf32> to vector<128xf32>
    %17 = vector.shape_cast %16 : vector<128xf32> to vector<1x128xf32>
    %18 = arith.mulf %15, %15 : vector<24x128xf32>
    %cst_6 = arith.constant dense<0.000000e+00> : vector<128xf32>
    %19 = vector.multi_reduction <add>, %18, %cst_6 [0] : vector<24x128xf32> to vector<128xf32>
    %20 = vector.shape_cast %19 : vector<128xf32> to vector<1x128xf32>
    %c0_7 = arith.constant 0 : index
    %c0_8 = arith.constant 0 : index
    %21 = vector.load %arg3[%c0_7, %c0_8] : memref<2x128xf32, #tpu.memory_space<vmem>>, vector<2x128xf32>
    %22 = tpu.concatenate %17, %20 in 0 : vector<1x128xf32>, vector<1x128xf32> -> vector<2x128xf32>
    %23 = arith.addf %21, %22 : vector<2x128xf32>
    %c0_9 = arith.constant 0 : index
    %c0_10 = arith.constant 0 : index
    %24 = vector.load %arg3[%c0_9, %c0_10] : memref<2x128xf32, #tpu.memory_space<vmem>>, vector<2x128xf32>
    tpu.vector_store %arg3[%c0_9, %c0_10], %23 {strides = array<i32>} : memref<2x128xf32, #tpu.memory_space<vmem>>, vector<2x128xf32>,
    return
  }
  func.func @transform_0(%arg0: i32) -> (i32, i32) {
    %c0_i32 = arith.constant 0 : i32
    %c0_i32_0 = arith.constant 0 : i32
    return %arg0, %c0_i32 : i32, i32
  }
  func.func @transform_1(%arg0: i32) -> (i32, i32) {
    %c0_i32 = arith.constant 0 : i32
    %c0_i32_0 = arith.constant 0 : i32
    %c0_i32_1 = arith.constant 0 : i32
    return %c0_i32, %c0_i32_0 : i32, i32
  }
  func.func @transform_2(%arg0: i32) -> (i32, i32) {
    %c0_i32 = arith.constant 0 : i32
    %c0_i32_0 = arith.constant 0 : i32
    %c0_i32_1 = arith.constant 0 : i32
    return %c0_i32, %c0_i32_0 : i32, i32
  }
}

module attributes {stable_mosaic.version = 11 : i64} {
  func.func @_dw_bn_kernel(%arg0: i32, %arg1: memref<64x128xf32, #tpu.memory_space<vmem>>, %arg2: memref<128x128xf32, #tpu.memory_space<vmem>>, %arg3: memref<1x128xf32, #tpu.memory_space<vmem>>, %arg4: memref<1x128xf32, #tpu.memory_space<vmem>>, %arg5: memref<9x128xf32, #tpu.memory_space<vmem>>, %arg6: memref<1x8x8x128xbf16, #tpu.memory_space<vmem>>, %arg7: memref<1x2x128xf32, #tpu.memory_space<vmem>>, %arg8: memref<10x24x128xf32, #tpu.memory_space<vmem>>) attributes {dimension_semantics = [#tpu.dimension_semantics<arbitrary>], iteration_bounds = array<i64: 2>, scalar_prefetch = 0 : i64, scratch_operands = 1 : i64, tpu.core_type = #tpu.core_type<tc>, window_params = [{transform_indices = @transform_0, window_bounds = array<i64: 64, 128>}, {pipeline_mode = #tpu.pipeline_mode<synchronous>, transform_indices = @transform_1, window_bounds = array<i64: 128, 128>}, {pipeline_mode = #tpu.pipeline_mode<synchronous>, transform_indices = @transform_2, window_bounds = array<i64: 1, 128>}, {pipeline_mode = #tpu.pipeline_mode<synchronous>, transform_indices = @transform_3, window_bounds = array<i64: 1, 128>}, {pipeline_mode = #tpu.pipeline_mode<synchronous>, transform_indices = @transform_4, window_bounds = array<i64: 9, 128>}, {transform_indices = @transform_5, window_bounds = array<i64: 1, 8, 8, 128>}, {transform_indices = @transform_6, window_bounds = array<i64: 1, 2, 128>}]} {
    %c0 = arith.constant 0 : index
    %c0_0 = arith.constant 0 : index
    %0 = vector.load %arg1[%c0, %c0_0] : memref<64x128xf32, #tpu.memory_space<vmem>>, vector<64x128xf32>
    %c0_1 = arith.constant 0 : index
    %c0_2 = arith.constant 0 : index
    %1 = vector.load %arg2[%c0_1, %c0_2] : memref<128x128xf32, #tpu.memory_space<vmem>>, vector<128x128xf32>
    %cst = arith.constant dense<0.000000e+00> : vector<64x128xf32>
    %2 = tpu.matmul %0, %1, %cst {dimension_numbers = #tpu.dot_dimension_numbers<[1], [0], [0], [1], [0, 0, 1, 1], [], []>} : vector<64x128xf32>, vector<128x128xf32>, vector<64x128xf32> -> vector<64x128xf32>
    %c0_3 = arith.constant 0 : index
    %c0_4 = arith.constant 0 : index
    %3 = vector.load %arg3[%c0_3, %c0_4] : memref<1x128xf32, #tpu.memory_space<vmem>>, vector<1x128xf32>
    %4 = vector.broadcast %3 : vector<1x128xf32> to vector<64x128xf32>
    %5 = arith.mulf %2, %4 : vector<64x128xf32>
    %c0_5 = arith.constant 0 : index
    %c0_6 = arith.constant 0 : index
    %6 = vector.load %arg4[%c0_5, %c0_6] : memref<1x128xf32, #tpu.memory_space<vmem>>, vector<1x128xf32>
    %7 = vector.broadcast %6 : vector<1x128xf32> to vector<64x128xf32>
    %8 = arith.addf %5, %7 : vector<64x128xf32>
    %cst_7 = arith.constant 0.000000e+00 : f32
    %9 = vector.broadcast %cst_7 : f32 to vector<64x128xf32>
    %10 = arith.maximumf %8, %9 : vector<64x128xf32>
    %c0_i32 = arith.constant 0 : i32
    %11 = arith.cmpi eq, %arg0, %c0_i32 : i32
    %12 = arith.extui %11 : i1 to i32
    %c0_i32_8 = arith.constant 0 : i32
    %13 = arith.cmpi ne, %12, %c0_i32_8 : i32
    scf.if %13 {
      %cst_81 = arith.constant 0.000000e+00 : f32
      %120 = vector.broadcast %cst_81 : f32 to vector<10x24x128xf32>
      %c0_82 = arith.constant 0 : index
      %c0_83 = arith.constant 0 : index
      %c0_84 = arith.constant 0 : index
      %121 = vector.load %arg8[%c0_82, %c0_83, %c0_84] : memref<10x24x128xf32, #tpu.memory_space<vmem>>, vector<10x24x128xf32>
      tpu.vector_store %arg8[%c0_82, %c0_83, %c0_84], %120 {strides = array<i32>} : memref<10x24x128xf32, #tpu.memory_space<vmem>>, vector<10x24x128xf32>,
    } else {
    }
    %14 = vector.extract_strided_slice %10 {offsets = [0, 0], sizes = [8, 128], strides = [1, 1]} : vector<64x128xf32> to vector<8x128xf32>
    %c1 = arith.constant 1 : index
    %c8 = arith.constant 8 : index
    %c0_9 = arith.constant 0 : index
    %15 = vector.load %arg8[%c1, %c8, %c0_9] : memref<10x24x128xf32, #tpu.memory_space<vmem>>, vector<1x8x128xf32>
    %16 = vector.shape_cast %15 : vector<1x8x128xf32> to vector<8x128xf32>
    %17 = vector.shape_cast %14 : vector<8x128xf32> to vector<1x8x128xf32>
    tpu.vector_store %arg8[%c1, %c8, %c0_9], %17 {strides = array<i32>} : memref<10x24x128xf32, #tpu.memory_space<vmem>>, vector<1x8x128xf32>,
    %18 = vector.extract_strided_slice %10 {offsets = [8, 0], sizes = [8, 128], strides = [1, 1]} : vector<64x128xf32> to vector<8x128xf32>
    %c2 = arith.constant 2 : index
    %c8_10 = arith.constant 8 : index
    %c0_11 = arith.constant 0 : index
    %19 = vector.load %arg8[%c2, %c8_10, %c0_11] : memref<10x24x128xf32, #tpu.memory_space<vmem>>, vector<1x8x128xf32>
    %20 = vector.shape_cast %19 : vector<1x8x128xf32> to vector<8x128xf32>
    %21 = vector.shape_cast %18 : vector<8x128xf32> to vector<1x8x128xf32>
    tpu.vector_store %arg8[%c2, %c8_10, %c0_11], %21 {strides = array<i32>} : memref<10x24x128xf32, #tpu.memory_space<vmem>>, vector<1x8x128xf32>,
    %22 = vector.extract_strided_slice %10 {offsets = [16, 0], sizes = [8, 128], strides = [1, 1]} : vector<64x128xf32> to vector<8x128xf32>
    %c3 = arith.constant 3 : index
    %c8_12 = arith.constant 8 : index
    %c0_13 = arith.constant 0 : index
    %23 = vector.load %arg8[%c3, %c8_12, %c0_13] : memref<10x24x128xf32, #tpu.memory_space<vmem>>, vector<1x8x128xf32>
    %24 = vector.shape_cast %23 : vector<1x8x128xf32> to vector<8x128xf32>
    %25 = vector.shape_cast %22 : vector<8x128xf32> to vector<1x8x128xf32>
    tpu.vector_store %arg8[%c3, %c8_12, %c0_13], %25 {strides = array<i32>} : memref<10x24x128xf32, #tpu.memory_space<vmem>>, vector<1x8x128xf32>,
    %26 = vector.extract_strided_slice %10 {offsets = [24, 0], sizes = [8, 128], strides = [1, 1]} : vector<64x128xf32> to vector<8x128xf32>
    %c4 = arith.constant 4 : index
    %c8_14 = arith.constant 8 : index
    %c0_15 = arith.constant 0 : index
    %27 = vector.load %arg8[%c4, %c8_14, %c0_15] : memref<10x24x128xf32, #tpu.memory_space<vmem>>, vector<1x8x128xf32>
    %28 = vector.shape_cast %27 : vector<1x8x128xf32> to vector<8x128xf32>
    %29 = vector.shape_cast %26 : vector<8x128xf32> to vector<1x8x128xf32>
    tpu.vector_store %arg8[%c4, %c8_14, %c0_15], %29 {strides = array<i32>} : memref<10x24x128xf32, #tpu.memory_space<vmem>>, vector<1x8x128xf32>,
    %30 = vector.extract_strided_slice %10 {offsets = [32, 0], sizes = [8, 128], strides = [1, 1]} : vector<64x128xf32> to vector<8x128xf32>
    %c5 = arith.constant 5 : index
    %c8_16 = arith.constant 8 : index
    %c0_17 = arith.constant 0 : index
    %31 = vector.load %arg8[%c5, %c8_16, %c0_17] : memref<10x24x128xf32, #tpu.memory_space<vmem>>, vector<1x8x128xf32>
    %32 = vector.shape_cast %31 : vector<1x8x128xf32> to vector<8x128xf32>
    %33 = vector.shape_cast %30 : vector<8x128xf32> to vector<1x8x128xf32>
    tpu.vector_store %arg8[%c5, %c8_16, %c0_17], %33 {strides = array<i32>} : memref<10x24x128xf32, #tpu.memory_space<vmem>>, vector<1x8x128xf32>,
    %34 = vector.extract_strided_slice %10 {offsets = [40, 0], sizes = [8, 128], strides = [1, 1]} : vector<64x128xf32> to vector<8x128xf32>
    %c6 = arith.constant 6 : index
    %c8_18 = arith.constant 8 : index
    %c0_19 = arith.constant 0 : index
    %35 = vector.load %arg8[%c6, %c8_18, %c0_19] : memref<10x24x128xf32, #tpu.memory_space<vmem>>, vector<1x8x128xf32>
    %36 = vector.shape_cast %35 : vector<1x8x128xf32> to vector<8x128xf32>
    %37 = vector.shape_cast %34 : vector<8x128xf32> to vector<1x8x128xf32>
    tpu.vector_store %arg8[%c6, %c8_18, %c0_19], %37 {strides = array<i32>} : memref<10x24x128xf32, #tpu.memory_space<vmem>>, vector<1x8x128xf32>,
    %38 = vector.extract_strided_slice %10 {offsets = [48, 0], sizes = [8, 128], strides = [1, 1]} : vector<64x128xf32> to vector<8x128xf32>
    %c7 = arith.constant 7 : index
    %c8_20 = arith.constant 8 : index
    %c0_21 = arith.constant 0 : index
    %39 = vector.load %arg8[%c7, %c8_20, %c0_21] : memref<10x24x128xf32, #tpu.memory_space<vmem>>, vector<1x8x128xf32>
    %40 = vector.shape_cast %39 : vector<1x8x128xf32> to vector<8x128xf32>
    %41 = vector.shape_cast %38 : vector<8x128xf32> to vector<1x8x128xf32>
    tpu.vector_store %arg8[%c7, %c8_20, %c0_21], %41 {strides = array<i32>} : memref<10x24x128xf32, #tpu.memory_space<vmem>>, vector<1x8x128xf32>,
    %42 = vector.extract_strided_slice %10 {offsets = [56, 0], sizes = [8, 128], strides = [1, 1]} : vector<64x128xf32> to vector<8x128xf32>
    %c8_22 = arith.constant 8 : index
    %c8_23 = arith.constant 8 : index
    %c0_24 = arith.constant 0 : index
    %43 = vector.load %arg8[%c8_22, %c8_23, %c0_24] : memref<10x24x128xf32, #tpu.memory_space<vmem>>, vector<1x8x128xf32>
    %44 = vector.shape_cast %43 : vector<1x8x128xf32> to vector<8x128xf32>
    %45 = vector.shape_cast %42 : vector<8x128xf32> to vector<1x8x128xf32>
    tpu.vector_store %arg8[%c8_22, %c8_23, %c0_24], %45 {strides = array<i32>} : memref<10x24x128xf32, #tpu.memory_space<vmem>>, vector<1x8x128xf32>,
    %cst_25 = arith.constant 0.000000e+00 : f32
    %46 = vector.broadcast %cst_25 : f32 to vector<8x8x128xf32>
    %c0_26 = arith.constant 0 : index
    %c7_27 = arith.constant 7 : index
    %c0_28 = arith.constant 0 : index
    %47 = vector.load %arg8[%c0_26, %c7_27, %c0_28] : memref<10x24x128xf32, #tpu.memory_space<vmem>>, vector<8x8x128xf32>
    %c0_29 = arith.constant 0 : index
    %c0_30 = arith.constant 0 : index
    %48 = vector.load %arg5[%c0_29, %c0_30] : memref<9x128xf32, #tpu.memory_space<vmem>>, vector<1x128xf32>
    %49 = vector.shape_cast %48 : vector<1x128xf32> to vector<1x1x128xf32>
    %50 = vector.broadcast %49 : vector<1x1x128xf32> to vector<8x8x128xf32>
    %51 = arith.mulf %47, %50 : vector<8x8x128xf32>
    %52 = arith.addf %46, %51 : vector<8x8x128xf32>
    %c0_31 = arith.constant 0 : index
    %c8_32 = arith.constant 8 : index
    %c0_33 = arith.constant 0 : index
    %53 = vector.load %arg8[%c0_31, %c8_32, %c0_33] : memref<10x24x128xf32, #tpu.memory_space<vmem>>, vector<8x8x128xf32>
    %c1_34 = arith.constant 1 : index
    %c0_35 = arith.constant 0 : index
    %54 = vector.load %arg5[%c1_34, %c0_35] : memref<9x128xf32, #tpu.memory_space<vmem>>, vector<1x128xf32>
    %55 = vector.shape_cast %54 : vector<1x128xf32> to vector<1x1x128xf32>
    %56 = vector.broadcast %55 : vector<1x1x128xf32> to vector<8x8x128xf32>
    %57 = arith.mulf %53, %56 : vector<8x8x128xf32>
    %58 = arith.addf %52, %57 : vector<8x8x128xf32>
    %c0_36 = arith.constant 0 : index
    %c9 = arith.constant 9 : index
    %c0_37 = arith.constant 0 : index
    %59 = vector.load %arg8[%c0_36, %c9, %c0_37] : memref<10x24x128xf32, #tpu.memory_space<vmem>>, vector<8x8x128xf32>
    %c2_38 = arith.constant 2 : index
    %c0_39 = arith.constant 0 : index
    %60 = vector.load %arg5[%c2_38, %c0_39] : memref<9x128xf32, #tpu.memory_space<vmem>>, vector<1x128xf32>
    %61 = vector.shape_cast %60 : vector<1x128xf32> to vector<1x1x128xf32>
    %62 = vector.broadcast %61 : vector<1x1x128xf32> to vector<8x8x128xf32>
    %63 = arith.mulf %59, %62 : vector<8x8x128xf32>
    %64 = arith.addf %58, %63 : vector<8x8x128xf32>
    %c1_40 = arith.constant 1 : index
    %c7_41 = arith.constant 7 : index
    %c0_42 = arith.constant 0 : index
    %65 = vector.load %arg8[%c1_40, %c7_41, %c0_42] : memref<10x24x128xf32, #tpu.memory_space<vmem>>, vector<8x8x128xf32>
    %c3_43 = arith.constant 3 : index
    %c0_44 = arith.constant 0 : index
    %66 = vector.load %arg5[%c3_43, %c0_44] : memref<9x128xf32, #tpu.memory_space<vmem>>, vector<1x128xf32>
    %67 = vector.shape_cast %66 : vector<1x128xf32> to vector<1x1x128xf32>
    %68 = vector.broadcast %67 : vector<1x1x128xf32> to vector<8x8x128xf32>
    %69 = arith.mulf %65, %68 : vector<8x8x128xf32>
    %70 = arith.addf %64, %69 : vector<8x8x128xf32>
    %c1_45 = arith.constant 1 : index
    %c8_46 = arith.constant 8 : index
    %c0_47 = arith.constant 0 : index
    %71 = vector.load %arg8[%c1_45, %c8_46, %c0_47] : memref<10x24x128xf32, #tpu.memory_space<vmem>>, vector<8x8x128xf32>
    %c4_48 = arith.constant 4 : index
    %c0_49 = arith.constant 0 : index
    %72 = vector.load %arg5[%c4_48, %c0_49] : memref<9x128xf32, #tpu.memory_space<vmem>>, vector<1x128xf32>
    %73 = vector.shape_cast %72 : vector<1x128xf32> to vector<1x1x128xf32>
    %74 = vector.broadcast %73 : vector<1x1x128xf32> to vector<8x8x128xf32>
    %75 = arith.mulf %71, %74 : vector<8x8x128xf32>
    %76 = arith.addf %70, %75 : vector<8x8x128xf32>
    %c1_50 = arith.constant 1 : index
    %c9_51 = arith.constant 9 : index
    %c0_52 = arith.constant 0 : index
    %77 = vector.load %arg8[%c1_50, %c9_51, %c0_52] : memref<10x24x128xf32, #tpu.memory_space<vmem>>, vector<8x8x128xf32>
    %c5_53 = arith.constant 5 : index
    %c0_54 = arith.constant 0 : index
    %78 = vector.load %arg5[%c5_53, %c0_54] : memref<9x128xf32, #tpu.memory_space<vmem>>, vector<1x128xf32>
    %79 = vector.shape_cast %78 : vector<1x128xf32> to vector<1x1x128xf32>
    %80 = vector.broadcast %79 : vector<1x1x128xf32> to vector<8x8x128xf32>
    %81 = arith.mulf %77, %80 : vector<8x8x128xf32>
    %82 = arith.addf %76, %81 : vector<8x8x128xf32>
    %c2_55 = arith.constant 2 : index
    %c7_56 = arith.constant 7 : index
    %c0_57 = arith.constant 0 : index
    %83 = vector.load %arg8[%c2_55, %c7_56, %c0_57] : memref<10x24x128xf32, #tpu.memory_space<vmem>>, vector<8x8x128xf32>
    %c6_58 = arith.constant 6 : index
    %c0_59 = arith.constant 0 : index
    %84 = vector.load %arg5[%c6_58, %c0_59] : memref<9x128xf32, #tpu.memory_space<vmem>>, vector<1x128xf32>
    %85 = vector.shape_cast %84 : vector<1x128xf32> to vector<1x1x128xf32>
    %86 = vector.broadcast %85 : vector<1x1x128xf32> to vector<8x8x128xf32>
    %87 = arith.mulf %83, %86 : vector<8x8x128xf32>
    %88 = arith.addf %82, %87 : vector<8x8x128xf32>
    %c2_60 = arith.constant 2 : index
    %c8_61 = arith.constant 8 : index
    %c0_62 = arith.constant 0 : index
    %89 = vector.load %arg8[%c2_60, %c8_61, %c0_62] : memref<10x24x128xf32, #tpu.memory_space<vmem>>, vector<8x8x128xf32>
    %c7_63 = arith.constant 7 : index
    %c0_64 = arith.constant 0 : index
    %90 = vector.load %arg5[%c7_63, %c0_64] : memref<9x128xf32, #tpu.memory_space<vmem>>, vector<1x128xf32>
    %91 = vector.shape_cast %90 : vector<1x128xf32> to vector<1x1x128xf32>
    %92 = vector.broadcast %91 : vector<1x1x128xf32> to vector<8x8x128xf32>
    %93 = arith.mulf %89, %92 : vector<8x8x128xf32>
    %94 = arith.addf %88, %93 : vector<8x8x128xf32>
    %c2_65 = arith.constant 2 : index
    %c9_66 = arith.constant 9 : index
    %c0_67 = arith.constant 0 : index
    %95 = vector.load %arg8[%c2_65, %c9_66, %c0_67] : memref<10x24x128xf32, #tpu.memory_space<vmem>>, vector<8x8x128xf32>
    %c8_68 = arith.constant 8 : index
    %c0_69 = arith.constant 0 : index
    %96 = vector.load %arg5[%c8_68, %c0_69] : memref<9x128xf32, #tpu.memory_space<vmem>>, vector<1x128xf32>
    %97 = vector.shape_cast %96 : vector<1x128xf32> to vector<1x1x128xf32>
    %98 = vector.broadcast %97 : vector<1x1x128xf32> to vector<8x8x128xf32>
    %99 = arith.mulf %95, %98 : vector<8x8x128xf32>
    %100 = arith.addf %94, %99 : vector<8x8x128xf32>
    %101 = arith.truncf %100 : vector<8x8x128xf32> to vector<8x8x128xbf16>
    %c0_70 = arith.constant 0 : index
    %c0_71 = arith.constant 0 : index
    %c0_72 = arith.constant 0 : index
    %c0_73 = arith.constant 0 : index
    %102 = vector.load %arg6[%c0_70, %c0_71, %c0_72, %c0_73] : memref<1x8x8x128xbf16, #tpu.memory_space<vmem>>, vector<1x8x8x128xbf16>
    %103 = vector.shape_cast %102 : vector<1x8x8x128xbf16> to vector<8x8x128xbf16>
    %104 = vector.shape_cast %101 : vector<8x8x128xbf16> to vector<1x8x8x128xbf16>
    tpu.vector_store %arg6[%c0_70, %c0_71, %c0_72, %c0_73], %104 {strides = array<i32>} : memref<1x8x8x128xbf16, #tpu.memory_space<vmem>>, vector<1x8x8x128xbf16>,
    %cst_74 = arith.constant dense<0.000000e+00> : vector<8x128xf32>
    %105 = vector.multi_reduction <add>, %100, %cst_74 [0] : vector<8x8x128xf32> to vector<8x128xf32>
    %106 = vector.shape_cast %105 : vector<8x128xf32> to vector<1x8x128xf32>
    %cst_75 = arith.constant dense<0.000000e+00> : vector<1x128xf32>
    %107 = vector.multi_reduction <add>, %106, %cst_75 [1] : vector<1x8x128xf32> to vector<1x128xf32>
    %108 = vector.shape_cast %107 : vector<1x128xf32> to vector<1x1x128xf32>
    %109 = arith.mulf %100, %100 : vector<8x8x128xf32>
    %cst_76 = arith.constant dense<0.000000e+00> : vector<8x128xf32>
    %110 = vector.multi_reduction <add>, %109, %cst_76 [0] : vector<8x8x128xf32> to vector<8x128xf32>
    %111 = vector.shape_cast %110 : vector<8x128xf32> to vector<1x8x128xf32>
    %cst_77 = arith.constant dense<0.000000e+00> : vector<1x128xf32>
    %112 = vector.multi_reduction <add>, %111, %cst_77 [1] : vector<1x8x128xf32> to vector<1x128xf32>
    %113 = vector.shape_cast %112 : vector<1x128xf32> to vector<1x1x128xf32>
    %114 = vector.shape_cast %108 : vector<1x1x128xf32> to vector<1x128xf32>
    %115 = vector.shape_cast %113 : vector<1x1x128xf32> to vector<1x128xf32>
    %116 = tpu.concatenate %114, %115 in 0 : vector<1x128xf32>, vector<1x128xf32> -> vector<2x128xf32>
    %c0_78 = arith.constant 0 : index
    %c0_79 = arith.constant 0 : index
    %c0_80 = arith.constant 0 : index
    %117 = vector.load %arg7[%c0_78, %c0_79, %c0_80] : memref<1x2x128xf32, #tpu.memory_space<vmem>>, vector<1x2x128xf32>
    %118 = vector.shape_cast %117 : vector<1x2x128xf32> to vector<2x128xf32>
    %119 = vector.shape_cast %116 : vector<2x128xf32> to vector<1x2x128xf32>
    tpu.vector_store %arg7[%c0_78, %c0_79, %c0_80], %119 {strides = array<i32>} : memref<1x2x128xf32, #tpu.memory_space<vmem>>, vector<1x2x128xf32>,
    return
  }
  func.func @transform_0(%arg0: i32) -> (i32, i32) {
    %c0_i32 = arith.constant 0 : i32
    %c0_i32_0 = arith.constant 0 : i32
    return %arg0, %c0_i32 : i32, i32
  }
  func.func @transform_1(%arg0: i32) -> (i32, i32) {
    %c0_i32 = arith.constant 0 : i32
    %c0_i32_0 = arith.constant 0 : i32
    %c0_i32_1 = arith.constant 0 : i32
    return %c0_i32, %c0_i32_0 : i32, i32
  }
  func.func @transform_2(%arg0: i32) -> (i32, i32) {
    %c0_i32 = arith.constant 0 : i32
    %c0_i32_0 = arith.constant 0 : i32
    %c0_i32_1 = arith.constant 0 : i32
    return %c0_i32, %c0_i32_0 : i32, i32
  }
  func.func @transform_3(%arg0: i32) -> (i32, i32) {
    %c0_i32 = arith.constant 0 : i32
    %c0_i32_0 = arith.constant 0 : i32
    %c0_i32_1 = arith.constant 0 : i32
    return %c0_i32, %c0_i32_0 : i32, i32
  }
  func.func @transform_4(%arg0: i32) -> (i32, i32) {
    %c0_i32 = arith.constant 0 : i32
    %c0_i32_0 = arith.constant 0 : i32
    %c0_i32_1 = arith.constant 0 : i32
    return %c0_i32, %c0_i32_0 : i32, i32
  }
  func.func @transform_5(%arg0: i32) -> (i32, i32, i32, i32) {
    %c0_i32 = arith.constant 0 : i32
    %c0_i32_0 = arith.constant 0 : i32
    %c0_i32_1 = arith.constant 0 : i32
    %c0_i32_2 = arith.constant 0 : i32
    return %arg0, %c0_i32, %c0_i32_0, %c0_i32_1 : i32, i32, i32, i32
  }
  func.func @transform_6(%arg0: i32) -> (i32, i32, i32) {
    %c0_i32 = arith.constant 0 : i32
    %c0_i32_0 = arith.constant 0 : i32
    %c0_i32_1 = arith.constant 0 : i32
    return %arg0, %c0_i32, %c0_i32_0 : i32, i32, i32
  }
}

module attributes {stable_mosaic.version = 11 : i64} {
  func.func @_conv3_stats_kernel(%arg0: i32, %arg1: memref<24x128xbf16, #tpu.memory_space<vmem>>, %arg2: memref<1x128xf32, #tpu.memory_space<vmem>>, %arg3: memref<1x128xf32, #tpu.memory_space<vmem>>, %arg4: memref<128x128xf32, #tpu.memory_space<vmem>>, %arg5: memref<2x128xf32, #tpu.memory_space<vmem>>) attributes {dimension_semantics = [#tpu.dimension_semantics<arbitrary>], iteration_bounds = array<i64: 6>, scalar_prefetch = 0 : i64, scratch_operands = 0 : i64, tpu.core_type = #tpu.core_type<tc>, window_params = [{transform_indices = @transform_0, window_bounds = array<i64: 24, 128>}, {pipeline_mode = #tpu.pipeline_mode<synchronous>, transform_indices = @transform_1, window_bounds = array<i64: 1, 128>}, {pipeline_mode = #tpu.pipeline_mode<synchronous>, transform_indices = @transform_2, window_bounds = array<i64: 1, 128>}, {pipeline_mode = #tpu.pipeline_mode<synchronous>, transform_indices = @transform_3, window_bounds = array<i64: 128, 128>}, {pipeline_mode = #tpu.pipeline_mode<synchronous>, transform_indices = @transform_4, window_bounds = array<i64: 2, 128>}]} {
    %c0_i32 = arith.constant 0 : i32
    %0 = arith.cmpi eq, %arg0, %c0_i32 : i32
    %1 = arith.extui %0 : i1 to i32
    %c0_i32_0 = arith.constant 0 : i32
    %2 = arith.cmpi ne, %1, %c0_i32_0 : i32
    scf.if %2 {
      %cst_16 = arith.constant 0.000000e+00 : f32
      %34 = vector.broadcast %cst_16 : f32 to vector<2x128xf32>
      %c0_17 = arith.constant 0 : index
      %c0_18 = arith.constant 0 : index
      %35 = vector.load %arg5[%c0_17, %c0_18] : memref<2x128xf32, #tpu.memory_space<vmem>>, vector<2x128xf32>
      tpu.vector_store %arg5[%c0_17, %c0_18], %34 {strides = array<i32>} : memref<2x128xf32, #tpu.memory_space<vmem>>, vector<2x128xf32>,
    } else {
    }
    %c0 = arith.constant 0 : index
    %c0_1 = arith.constant 0 : index
    %3 = vector.load %arg1[%c0, %c0_1] : memref<24x128xbf16, #tpu.memory_space<vmem>>, vector<24x128xbf16>
    %4 = arith.extf %3 : vector<24x128xbf16> to vector<24x128xf32>
    %c0_2 = arith.constant 0 : index
    %c0_3 = arith.constant 0 : index
    %5 = vector.load %arg2[%c0_2, %c0_3] : memref<1x128xf32, #tpu.memory_space<vmem>>, vector<1x128xf32>
    %6 = vector.broadcast %5 : vector<1x128xf32> to vector<24x128xf32>
    %7 = arith.mulf %4, %6 : vector<24x128xf32>
    %c0_4 = arith.constant 0 : index
    %c0_5 = arith.constant 0 : index
    %8 = vector.load %arg3[%c0_4, %c0_5] : memref<1x128xf32, #tpu.memory_space<vmem>>, vector<1x128xf32>
    %9 = vector.broadcast %8 : vector<1x128xf32> to vector<24x128xf32>
    %10 = arith.addf %7, %9 : vector<24x128xf32>
    %cst = arith.constant 0.000000e+00 : f32
    %11 = vector.broadcast %cst : f32 to vector<24x128xf32>
    %12 = arith.maximumf %10, %11 : vector<24x128xf32>
    %c0_6 = arith.constant 0 : index
    %c0_7 = arith.constant 0 : index
    %13 = vector.load %arg4[%c0_6, %c0_7] : memref<128x128xf32, #tpu.memory_space<vmem>>, vector<128x128xf32>
    %cst_8 = arith.constant dense<0.000000e+00> : vector<24x128xf32>
    %14 = tpu.matmul %12, %13, %cst_8 {dimension_numbers = #tpu.dot_dimension_numbers<[1], [0], [0], [1], [0, 0, 1, 1], [], []>} : vector<24x128xf32>, vector<128x128xf32>, vector<24x128xf32> -> vector<24x128xf32>
    %15 = tpu.iota {dimensions = array<i32: 0>} : vector<24x1xi32>
    %c24_i32 = arith.constant 24 : i32
    %16 = arith.muli %arg0, %c24_i32 : i32
    %17 = vector.broadcast %16 : i32 to vector<24x1xi32>
    %18 = arith.addi %15, %17 : vector<24x1xi32>
    %c128_i32 = arith.constant 128 : i32
    %19 = vector.broadcast %c128_i32 : i32 to vector<24x1xi32>
    %20 = arith.cmpi slt, %18, %19 : vector<24x1xi32>
    %cst_9 = arith.constant 0.000000e+00 : f32
    %21 = vector.shape_cast %20 : vector<24x1xi1> to vector<24x1xi1>
    %22 = vector.broadcast %21 : vector<24x1xi1> to vector<24x128xi1>
    %23 = vector.broadcast %cst_9 : f32 to vector<24x128xf32>
    %24 = arith.select %22, %14, %23 : vector<24x128xi1>, vector<24x128xf32>
    %cst_10 = arith.constant dense<0.000000e+00> : vector<128xf32>
    %25 = vector.multi_reduction <add>, %24, %cst_10 [0] : vector<24x128xf32> to vector<128xf32>
    %26 = vector.shape_cast %25 : vector<128xf32> to vector<1x128xf32>
    %27 = arith.mulf %24, %24 : vector<24x128xf32>
    %cst_11 = arith.constant dense<0.000000e+00> : vector<128xf32>
    %28 = vector.multi_reduction <add>, %27, %cst_11 [0] : vector<24x128xf32> to vector<128xf32>
    %29 = vector.shape_cast %28 : vector<128xf32> to vector<1x128xf32>
    %c0_12 = arith.constant 0 : index
    %c0_13 = arith.constant 0 : index
    %30 = vector.load %arg5[%c0_12, %c0_13] : memref<2x128xf32, #tpu.memory_space<vmem>>, vector<2x128xf32>
    %31 = tpu.concatenate %26, %29 in 0 : vector<1x128xf32>, vector<1x128xf32> -> vector<2x128xf32>
    %32 = arith.addf %30, %31 : vector<2x128xf32>
    %c0_14 = arith.constant 0 : index
    %c0_15 = arith.constant 0 : index
    %33 = vector.load %arg5[%c0_14, %c0_15] : memref<2x128xf32, #tpu.memory_space<vmem>>, vector<2x128xf32>
    tpu.vector_store %arg5[%c0_14, %c0_15], %32 {strides = array<i32>} : memref<2x128xf32, #tpu.memory_space<vmem>>, vector<2x128xf32>,
    return
  }
  func.func @transform_0(%arg0: i32) -> (i32, i32) {
    %c0_i32 = arith.constant 0 : i32
    %c0_i32_0 = arith.constant 0 : i32
    return %arg0, %c0_i32 : i32, i32
  }
  func.func @transform_1(%arg0: i32) -> (i32, i32) {
    %c0_i32 = arith.constant 0 : i32
    %c0_i32_0 = arith.constant 0 : i32
    %c0_i32_1 = arith.constant 0 : i32
    return %c0_i32, %c0_i32_0 : i32, i32
  }
  func.func @transform_2(%arg0: i32) -> (i32, i32) {
    %c0_i32 = arith.constant 0 : i32
    %c0_i32_0 = arith.constant 0 : i32
    %c0_i32_1 = arith.constant 0 : i32
    return %c0_i32, %c0_i32_0 : i32, i32
  }
  func.func @transform_3(%arg0: i32) -> (i32, i32) {
    %c0_i32 = arith.constant 0 : i32
    %c0_i32_0 = arith.constant 0 : i32
    %c0_i32_1 = arith.constant 0 : i32
    return %c0_i32, %c0_i32_0 : i32, i32
  }
  func.func @transform_4(%arg0: i32) -> (i32, i32) {
    %c0_i32 = arith.constant 0 : i32
    %c0_i32_0 = arith.constant 0 : i32
    %c0_i32_1 = arith.constant 0 : i32
    return %c0_i32, %c0_i32_0 : i32, i32
  }
}

module attributes {stable_mosaic.version = 11 : i64} {
  func.func @_out_s1_kernel(%arg0: i32, %arg1: memref<24x128xbf16, #tpu.memory_space<vmem>>, %arg2: memref<24x128xf32, #tpu.memory_space<vmem>>, %arg3: memref<1x128xf32, #tpu.memory_space<vmem>>, %arg4: memref<1x128xf32, #tpu.memory_space<vmem>>, %arg5: memref<128x128xf32, #tpu.memory_space<vmem>>, %arg6: memref<1x128xf32, #tpu.memory_space<vmem>>, %arg7: memref<1x128xf32, #tpu.memory_space<vmem>>, %arg8: memref<24x128xf32, #tpu.memory_space<vmem>>) attributes {dimension_semantics = [#tpu.dimension_semantics<parallel>], iteration_bounds = array<i64: 6>, scalar_prefetch = 0 : i64, scratch_operands = 0 : i64, tpu.core_type = #tpu.core_type<tc>, window_params = [{transform_indices = @transform_0, window_bounds = array<i64: 24, 128>}, {transform_indices = @transform_1, window_bounds = array<i64: 24, 128>}, {pipeline_mode = #tpu.pipeline_mode<synchronous>, transform_indices = @transform_2, window_bounds = array<i64: 1, 128>}, {pipeline_mode = #tpu.pipeline_mode<synchronous>, transform_indices = @transform_3, window_bounds = array<i64: 1, 128>}, {pipeline_mode = #tpu.pipeline_mode<synchronous>, transform_indices = @transform_4, window_bounds = array<i64: 128, 128>}, {pipeline_mode = #tpu.pipeline_mode<synchronous>, transform_indices = @transform_5, window_bounds = array<i64: 1, 128>}, {pipeline_mode = #tpu.pipeline_mode<synchronous>, transform_indices = @transform_6, window_bounds = array<i64: 1, 128>}, {transform_indices = @transform_7, window_bounds = array<i64: 24, 128>}]} {
    %c0 = arith.constant 0 : index
    %c0_0 = arith.constant 0 : index
    %0 = vector.load %arg1[%c0, %c0_0] : memref<24x128xbf16, #tpu.memory_space<vmem>>, vector<24x128xbf16>
    %1 = arith.extf %0 : vector<24x128xbf16> to vector<24x128xf32>
    %c0_1 = arith.constant 0 : index
    %c0_2 = arith.constant 0 : index
    %2 = vector.load %arg3[%c0_1, %c0_2] : memref<1x128xf32, #tpu.memory_space<vmem>>, vector<1x128xf32>
    %3 = vector.broadcast %2 : vector<1x128xf32> to vector<24x128xf32>
    %4 = arith.mulf %1, %3 : vector<24x128xf32>
    %c0_3 = arith.constant 0 : index
    %c0_4 = arith.constant 0 : index
    %5 = vector.load %arg4[%c0_3, %c0_4] : memref<1x128xf32, #tpu.memory_space<vmem>>, vector<1x128xf32>
    %6 = vector.broadcast %5 : vector<1x128xf32> to vector<24x128xf32>
    %7 = arith.addf %4, %6 : vector<24x128xf32>
    %cst = arith.constant 0.000000e+00 : f32
    %8 = vector.broadcast %cst : f32 to vector<24x128xf32>
    %9 = arith.maximumf %7, %8 : vector<24x128xf32>
    %c0_5 = arith.constant 0 : index
    %c0_6 = arith.constant 0 : index
    %10 = vector.load %arg5[%c0_5, %c0_6] : memref<128x128xf32, #tpu.memory_space<vmem>>, vector<128x128xf32>
    %cst_7 = arith.constant dense<0.000000e+00> : vector<24x128xf32>
    %11 = tpu.matmul %9, %10, %cst_7 {dimension_numbers = #tpu.dot_dimension_numbers<[1], [0], [0], [1], [0, 0, 1, 1], [], []>} : vector<24x128xf32>, vector<128x128xf32>, vector<24x128xf32> -> vector<24x128xf32>
    %c0_8 = arith.constant 0 : index
    %c0_9 = arith.constant 0 : index
    %12 = vector.load %arg6[%c0_8, %c0_9] : memref<1x128xf32, #tpu.memory_space<vmem>>, vector<1x128xf32>
    %13 = vector.broadcast %12 : vector<1x128xf32> to vector<24x128xf32>
    %14 = arith.mulf %11, %13 : vector<24x128xf32>
    %c0_10 = arith.constant 0 : index
    %c0_11 = arith.constant 0 : index
    %15 = vector.load %arg7[%c0_10, %c0_11] : memref<1x128xf32, #tpu.memory_space<vmem>>, vector<1x128xf32>
    %16 = vector.broadcast %15 : vector<1x128xf32> to vector<24x128xf32>
    %17 = arith.addf %14, %16 : vector<24x128xf32>
    %c0_12 = arith.constant 0 : index
    %c0_13 = arith.constant 0 : index
    %18 = vector.load %arg2[%c0_12, %c0_13] : memref<24x128xf32, #tpu.memory_space<vmem>>, vector<24x128xf32>
    %19 = arith.addf %17, %18 : vector<24x128xf32>
    %cst_14 = arith.constant 0.000000e+00 : f32
    %20 = vector.broadcast %cst_14 : f32 to vector<24x128xf32>
    %21 = arith.maximumf %19, %20 : vector<24x128xf32>
    %c0_15 = arith.constant 0 : index
    %c0_16 = arith.constant 0 : index
    %22 = vector.load %arg8[%c0_15, %c0_16] : memref<24x128xf32, #tpu.memory_space<vmem>>, vector<24x128xf32>
    tpu.vector_store %arg8[%c0_15, %c0_16], %21 {strides = array<i32>} : memref<24x128xf32, #tpu.memory_space<vmem>>, vector<24x128xf32>,
    return
  }
  func.func @transform_0(%arg0: i32) -> (i32, i32) {
    %c0_i32 = arith.constant 0 : i32
    %c0_i32_0 = arith.constant 0 : i32
    return %arg0, %c0_i32 : i32, i32
  }
  func.func @transform_1(%arg0: i32) -> (i32, i32) {
    %c0_i32 = arith.constant 0 : i32
    %c0_i32_0 = arith.constant 0 : i32
    return %arg0, %c0_i32 : i32, i32
  }
  func.func @transform_2(%arg0: i32) -> (i32, i32) {
    %c0_i32 = arith.constant 0 : i32
    %c0_i32_0 = arith.constant 0 : i32
    %c0_i32_1 = arith.constant 0 : i32
    return %c0_i32, %c0_i32_0 : i32, i32
  }
  func.func @transform_3(%arg0: i32) -> (i32, i32) {
    %c0_i32 = arith.constant 0 : i32
    %c0_i32_0 = arith.constant 0 : i32
    %c0_i32_1 = arith.constant 0 : i32
    return %c0_i32, %c0_i32_0 : i32, i32
  }
  func.func @transform_4(%arg0: i32) -> (i32, i32) {
    %c0_i32 = arith.constant 0 : i32
    %c0_i32_0 = arith.constant 0 : i32
    %c0_i32_1 = arith.constant 0 : i32
    return %c0_i32, %c0_i32_0 : i32, i32
  }
  func.func @transform_5(%arg0: i32) -> (i32, i32) {
    %c0_i32 = arith.constant 0 : i32
    %c0_i32_0 = arith.constant 0 : i32
    %c0_i32_1 = arith.constant 0 : i32
    return %c0_i32, %c0_i32_0 : i32, i32
  }
  func.func @transform_6(%arg0: i32) -> (i32, i32) {
    %c0_i32 = arith.constant 0 : i32
    %c0_i32_0 = arith.constant 0 : i32
    %c0_i32_1 = arith.constant 0 : i32
    return %c0_i32, %c0_i32_0 : i32, i32
  }
  func.func @transform_7(%arg0: i32) -> (i32, i32) {
    %c0_i32 = arith.constant 0 : i32
    %c0_i32_0 = arith.constant 0 : i32
    return %arg0, %c0_i32 : i32, i32
  }
}

</mosaic_0001>

<bundles_post_ra>
// kernel: bottleneck_pallas.4
= control target key start
LH: loop header
LB: loop body
LE: loop exit
PB: predicated region body
PF: predicated region fallthrough
CT: control target
= control target key end

     0   :  { %s475_s9 = smov 0   ;;  %s559_s0 = inlined_call_operand.vmem [shape: f32[128,128], index: 0, kind: input, shape index: {}]   ;;  %s560_s1 = inlined_call_operand.vmem [shape: f32[128,128], index: 1, kind: input, shape index: {}]   ;;  %s561_s2 = inlined_call_operand.vmem [shape: f32[2,128], index: 2, kind: output, shape index: {}]  }
   0x1 LB: > { %s481_s10 = sadd.s32 4294967295, %s454_s9   ;;  %p331_p0 = scmp.ge.s32.totalorder %s454_s9, 1  ;;  %s454_s9 = sphi %s475_s9, %s12_s9  }
   0x2   : > { %p116_p1 = scmp.lt.s32.totalorder %s454_s9, 7 }
   0x4   : > { %p117_p2 = pnand %p331_p0, %p116_p1 }
   0x5   : > { %s137_s11 = smul.u32 (!%p117_p2), 3, %s481_s10  ;;  %p333_p4 = scmp.ne.s32.totalorder (!%p117_p2), %s481_s10, 0 }
   0x6   : > { %120 = sbr.rel (%p117_p2) target bundleno = 291 (0x123), region = 28 }
   0x7   : > { %p142_p3 = scmp.lt.s32.totalorder (!%p117_p2), %s137_s11, 15 }
   0xd   : > { %s563_s11 = smov (!%p142_p3, %s137_s11), 15  ;;  %154 = sbr.rel (%p333_p4) target bundleno = 20 (0x14), region = 32 }
   0xe   : > { %s332_s12 = sshll.u32 %s563_s11, 3  ;;  %v456_v0 = vmov (!%p333_p4), 0.0  }
   0xf   : > { %s489_s15 = scalar_lea.vmem %s559_s0, %s332_s12  ;;  %155 = vst [vmem:[%s561_s2] sm:$0x3] (!%p333_p4), %v456_v0 }
  0x14 PF: > { %v159_v1 = vld [vmem:[%s560_s1] sm:$0xff]  ;;  %v160_v2 = vld [vmem:[%s560_s1 + $0x8] sm:$0xff]  ;;  %v161_v3 = vld [vmem:[%s560_s1 + $0x10] sm:$0xff]  ;;  %v457_v4 = vmov 0.0|0.0   ;;  %vm458_vm0 = vmmov 0   ;;  %v459_v7 = vmov 0.0   ;;  %v255_v30 = vlaneseq }
  0x15   : > { %396 = vmatprep.subr.bf16.mxu0 %v457_v4  ;;  %420 = vmatprep.subr.bf16.mxu1 %v457_v4  ;;  %v397_v5 = vpack.c.bf16 %v160_v2, %v159_v1  ;;  %v162_v6 = vld [vmem:[%s560_s1 + $0x18] sm:$0xff]  ;;  %v163_v9 = vld [vmem:[%s560_s1 + $0x20] sm:$0xff]  ;;  %v164_v10 = vld [vmem:[%s560_s1 + $0x28] sm:$0xff]  ;;  %s259_s25 = smul.u32 24, %s481_s10  ;;  %vm296_vm4 = vcmask 1040384  }
  0x16   : > { %387 = vmatprep.mubr.msk.f32.mxu0 %vm458_vm0, %v459_v7  ;;  %390 = vmatprep.mubr.msk.f32.mxu1 %vm458_vm0, %v459_v7  ;;  %v400_v8 = vpack.c.bf16 %v162_v6, %v161_v3  ;;  %v403_v11 = vpack.c.bf16 %v164_v10, %v163_v9  ;;  %v165_v12 = vld [vmem:[%s560_s1 + $0x30] sm:$0xff]  ;;  %v166_v13 = vld [vmem:[%s560_s1 + $0x38] sm:$0xff]  ;;  %v167_v15 = vld [vmem:[%s560_s1 + $0x40] sm:$0xff]  ;;  %v256_v31 = vshrl.u32 %v255_v30, 7 }
  0x17   : > { %398 = vmatpush3.bf16.msra.mxu0 %v397_v5  ;;  %428 = vmatpush3.bf16.msra.mxu1 %v397_v5  ;;  %v406_v14 = vpack.c.bf16 %v166_v13, %v165_v12  ;;  %v168_v16 = vld [vmem:[%s560_s1 + $0x48] sm:$0xff]  ;;  %v169_v18 = vld [vmem:[%s560_s1 + $0x50] sm:$0xff]  ;;  %v170_v19 = vld [vmem:[%s560_s1 + $0x58] sm:$0xff]  ;;  %v260_v33 = vstv %s259_s25 }
  0x18   : > { %399 = vmatprep.subr.bf16.mxu0 %v457_v4  ;;  %421 = vmatprep.subr.bf16.mxu1 %v457_v4  ;;  %v409_v17 = vpack.c.bf16 %v168_v16, %v167_v15  ;;  %v412_v20 = vpack.c.bf16 %v170_v19, %v169_v18  ;;  %v171_v21 = vld [vmem:[%s560_s1 + $0x60] sm:$0xff]  ;;  %v172_v22 = vld [vmem:[%s560_s1 + $0x68] sm:$0xff]  ;;  %v173_v24 = vld [vmem:[%s560_s1 + $0x70] sm:$0xff]  ;;  %v257_v32 = vadd.s32 8, %v256_v31  ;;  %v261_v34 = vadd.s32 %v260_v33, %v256_v31 }
  0x19   : > { %v415_v23 = vpack.c.bf16 %v172_v22, %v171_v21  ;;  %v174_v25 = vld [vmem:[%s560_s1 + $0x78] sm:$0xff]  ;;  %v156_v27 = vld [vmem:[%s489_s15] sm:$0xff]  ;;  %v157_v28 = vld [vmem:[%s489_s15 + $0x8] sm:$0xff]  ;;  %v258_v36 = vadd.s32 16, %v256_v31 }
  0x1a   : > { %v418_v26 = vpack.c.bf16 %v174_v25, %v173_v24  ;;  %v158_v29 = vld [vmem:[%s489_s15 + $0x10] sm:$0xff]  ;;  %v262_v35 = vadd.s32 %v260_v33, %v257_v32  ;;  %vm264_vm1 = vcmp.lt.s32.totalorder %v261_v34, 128  ;;  %v295_v2 = vld [vmem:[%s561_s2] sm:$0x3] }
  0x1b   : > { %401 = vmatpush3.bf16.msra.mxu0 %v400_v8  ;;  %429 = vmatpush3.bf16.msra.mxu1 %v400_v8  ;;  %v263_v37 = vadd.s32 %v260_v33, %v258_v36 }
  0x1c   : > { %402 = vmatprep.subr.bf16.mxu0 %v457_v4  ;;  %422 = vmatprep.subr.bf16.mxu1 %v457_v4  ;;  %vm265_vm2 = vcmp.lt.s32.totalorder %v262_v35, 128 }
  0x1d   : > { %vm266_vm3 = vcmp.lt.s32.totalorder %v263_v37, 128 }
  0x1f   : > { %404 = vmatpush3.bf16.msra.mxu0 %v403_v11  ;;  %430 = vmatpush3.bf16.msra.mxu1 %v403_v11 }
  0x20   : > { %405 = vmatprep.subr.bf16.mxu0 %v457_v4  ;;  %423 = vmatprep.subr.bf16.mxu1 %v457_v4 }
  0x23   : > { %407 = vmatpush3.bf16.msra.mxu0 %v406_v14  ;;  %431 = vmatpush3.bf16.msra.mxu1 %v406_v14 }
  0x24   : > { %408 = vmatprep.subr.bf16.mxu0 %v457_v4  ;;  %424 = vmatprep.subr.bf16.mxu1 %v457_v4 }
  0x27   : > { %410 = vmatpush3.bf16.msra.mxu0 %v409_v17  ;;  %432 = vmatpush3.bf16.msra.mxu1 %v409_v17 }
  0x28   : > { %411 = vmatprep.subr.bf16.mxu0 %v457_v4  ;;  %425 = vmatprep.subr.bf16.mxu1 %v457_v4 }
  0x2b   : > { %413 = vmatpush3.bf16.msra.mxu0 %v412_v20  ;;  %433 = vmatpush3.bf16.msra.mxu1 %v412_v20 }
  0x2c   : > { %414 = vmatprep.subr.bf16.mxu0 %v457_v4  ;;  %426 = vmatprep.subr.bf16.mxu1 %v457_v4 }
  0x2f   : > { %416 = vmatpush3.bf16.msra.mxu0 %v415_v23  ;;  %434 = vmatpush3.bf16.msra.mxu1 %v415_v23 }
  0x30   : > { %417 = vmatprep.subr.bf16.mxu0 %v457_v4  ;;  %427 = vmatprep.subr.bf16.mxu1 %v457_v4 }
  0x33   : > { %419 = vmatpush3.bf16.msra.mxu0 %v418_v26  ;;  %435 = vmatpush3.bf16.msra.mxu1 %v418_v26 }
  0x36   : > { %388 = vmatmul.mubr.f32.vlgmr.msra.gmra.mrb[0].mxu0 %v156_v27  ;;  %391 = vmatmul.mubr.f32.vlgmr.msra.gmra.mrb[0].mxu1 %v157_v28 }
  0x37   : > { %393 = vmatprep.mubr.msk.f32.mxu1 %vm458_vm0, %v459_v7 }
  0x3a   : > { %394 = vmatmul.mubr.f32.gmra.mrb[2].mxu1 %v158_v29 }
 0x109   : > { %v241_v38 = vpop.f32.mrb[0].mxu0  ;;  %v246_v39 = vpop.f32.mrb[0].mxu1 }
 0x10a   : > { %v273_v40 = vsel %vm264_vm1, %v241_v38, 0.0  ;;  %v274_v41 = vsel %vm265_vm2, %v246_v39, 0.0  ;;  %v392_v42 = vpop.f32.mrb[1].mxu1  ;;  %v389_v43 = vpop.f32.mrb[1].mxu0 }
 0x10b   : > { %v284_v44 = vmul.f32 %v273_v40, %v273_v40  ;;  %v276_v45 = vadd.f32 %v274_v41, %v273_v40  ;;  %v285_v46 = vmul.f32 %v274_v41, %v274_v41 }
 0x10d   : > { %v287_v47 = vadd.f32 %v285_v46, %v284_v44  ;;  %v251_v48 = vpop.f32.mrb[2].mxu1 }
 0x10e   : > { %v275_v49 = vsel %vm266_vm3, %v251_v48, 0.0  ;;  %v395_v50 = vpop.f32.mrb[3].mxu1 }
 0x10f   : > { %v277_v51 = vadd.f32 %v276_v45, %v275_v49  ;;  %v286_v52 = vmul.f32 %v275_v49, %v275_v49 }
 0x111   : > { %v278_v53 = vrot.slane %v277_v51, 4  ;;  %v288_v54 = vadd.f32 %v287_v47, %v286_v52 }
 0x113   : > { %v279_v55 = vadd.f32 %v278_v53, %v277_v51  ;;  %v289_v56 = vrot.slane %v288_v54, 4 }
 0x115   : > { %v280_v57 = vrot.slane %v279_v55, 2  ;;  %v290_v58 = vadd.f32 %v289_v56, %v288_v54 }
 0x117   : > { %v281_v59 = vadd.f32 %v280_v57, %v279_v55  ;;  %v291_v60 = vrot.slane %v290_v58, 2 }
 0x119   : > { %v282_v61 = vrot.slane %v281_v59, 1  ;;  %v292_v62 = vadd.f32 %v291_v60, %v290_v58 }
 0x11b   : > { %v293_v63 = vrot.slane %v292_v62, 1  ;;  %v283_v0 = vadd.f32 %v282_v61, %v281_v59 }
 0x11d   : > { %v294_v1 = vadd.f32 %v293_v63, %v292_v62 }
 0x11f   : > { %v297_v3 = vsel %vm296_vm4, %v283_v0, %v294_v1 }
 0x120   : > { %v298_v4 = vadd.f32 %v297_v3, %v295_v2 }
 0x122   : > { %299 = vst [vmem:[%s561_s2] sm:$0x3] %v298_v4 }
 0x123 PF: > { %s12_s9 = sadd.s32 1, %s454_s9  }
 0x124   : > { %p9_p5 = scmp.ge.s32.totalorder %s12_s9, 8  }
 0x126   :  { %11 = sbr.rel (!%p9_p5) target bundleno = 1 (0x1), region = 58 }

// kernel: bottleneck_pallas.5
= control target key start
LH: loop header
LB: loop body
LE: loop exit
PB: predicated region body
PF: predicated region fallthrough
CT: control target
= control target key end

     0   :  { %s1099_s21 = smov 0   ;;  %s1399_s0 = inlined_call_operand.vmem [shape: f32[128,128], index: 0, kind: input, shape index: {}]   ;;  %s1400_s1 = inlined_call_operand.vmem [shape: f32[128,128], index: 1, kind: input, shape index: {}]   ;;  %s1401_s2 = inlined_call_operand.vmem [shape: f32[1,128], index: 2, kind: input, shape index: {}]   ;;  %s1402_s3 = inlined_call_operand.vmem [shape: f32[1,128], index: 3, kind: input, shape index: {}]   ;;  %s1403_s4 = inlined_call_operand.vmem [shape: f32[9,128], index: 4, kind: input, shape index: {}]   ;;  %s1404_s5 = inlined_call_operand.vmem [shape: bf16[2,8,8,128], index: 5, kind: output, shape index: {0}]   ;;  %s1405_s6 = inlined_call_operand.vmem [shape: f32[2,2,128], index: 6, kind: output, shape index: {1}]  }
   0x1 LB: > { %s1105_s22 = sadd.s32 4294967295, %s1061_s21   ;;  %p886_p0 = scmp.ge.s32.totalorder %s1061_s21, 1  ;;  %s1061_s21 = sphi %s1099_s21, %s17_s21  }
   0x2   : > { %p216_p1 = scmp.lt.s32.totalorder %s1061_s21, 3 }
   0x4   : > { %p217_p2 = pnand %p886_p0, %p216_p1 }
   0x5   : > { %p256_p3 = scmp.lt.s32.totalorder (!%p217_p2), %s1105_s22, 1  ;;  %v273_v0 = vld [vmem:[%s1400_s1] sm:$0xff] (!%p217_p2)  ;;  %v274_v1 = vld [vmem:[%s1400_s1 + $0x8] sm:$0xff] (!%p217_p2)  ;;  %v275_v2 = vld [vmem:[%s1400_s1 + $0x10] sm:$0xff] (!%p217_p2)  ;;  %s887_s29 = sshll.u32 (!%p217_p2), %s1105_s22, 3 }
   0x6   : > { %220 = sbr.rel (%p217_p2) target bundleno = 329 (0x149), region = 40  ;;  %v998_v3 = vpack.c.bf16 (!%p217_p2), %v274_v1, %v273_v0  ;;  %v276_v4 = vld [vmem:[%s1400_s1 + $0x18] sm:$0xff] (!%p217_p2)  ;;  %p251_p4 = scmp.lt.s32.totalorder (!%p217_p2), %s887_s29, 15  ;;  %v277_v6 = vld [vmem:[%s1400_s1 + $0x20] sm:$0xff] (!%p217_p2)  ;;  %v278_v7 = vld [vmem:[%s1400_s1 + $0x28] sm:$0xff] (!%p217_p2) }
   0x7   : > { %v1002_v5 = vpack.c.bf16 (!%p217_p2), %v276_v4, %v275_v2  ;;  %v1006_v8 = vpack.c.bf16 (!%p217_p2), %v278_v7, %v277_v6  ;;  %v279_v9 = vld [vmem:[%s1400_s1 + $0x30] sm:$0xff] (!%p217_p2)  ;;  %v280_v10 = vld [vmem:[%s1400_s1 + $0x38] sm:$0xff] (!%p217_p2)  ;;  %v281_v14 = vld [vmem:[%s1400_s1 + $0x40] sm:$0xff] (!%p217_p2)  ;;  %p894_p5 = scmp.ne.s32.totalorder (!%p217_p2), %s1105_s22, 0 }
   0x8   : > { %999 = vmatprep.subr.bf16.mxu0 (!%p217_p2), %v998_v3  ;;  %1030 = vmatprep.subr.bf16.mxu1 (!%p217_p2), %v998_v3  ;;  %v1010_v13 = vpack.c.bf16 (!%p217_p2), %v280_v10, %v279_v9  ;;  %v282_v15 = vld [vmem:[%s1400_s1 + $0x48] sm:$0xff] (!%p217_p2)  ;;  %v283_v17 = vld [vmem:[%s1400_s1 + $0x50] sm:$0xff] (!%p217_p2)  ;;  %v284_v18 = vld [vmem:[%s1400_s1 + $0x58] sm:$0xff] (!%p217_p2) }
   0x9   : > { %1001 = vmatpush3.bf16.msra.mxu0 (!%p217_p2), %v998_v3  ;;  %1038 = vmatpush3.bf16.msra.mxu1 (!%p217_p2), %v998_v3  ;;  %v1014_v16 = vpack.c.bf16 (!%p217_p2), %v282_v15, %v281_v14  ;;  %v1018_v19 = vpack.c.bf16 (!%p217_p2), %v284_v18, %v283_v17  ;;  %v285_v20 = vld [vmem:[%s1400_s1 + $0x60] sm:$0xff] (!%p217_p2)  ;;  %v286_v21 = vld [vmem:[%s1400_s1 + $0x68] sm:$0xff] (!%p217_p2)  ;;  %v287_v23 = vld [vmem:[%s1400_s1 + $0x70] sm:$0xff] (!%p217_p2) }
   0xa   : > { %1003 = vmatprep.subr.bf16.mxu0 (!%p217_p2), %v1002_v5  ;;  %1031 = vmatprep.subr.bf16.mxu1 (!%p217_p2), %v1002_v5  ;;  %v1022_v22 = vpack.c.bf16 (!%p217_p2), %v286_v21, %v285_v20  ;;  %v288_v24 = vld [vmem:[%s1400_s1 + $0x78] sm:$0xff] (!%p217_p2)  ;;  %v892_v32 = vld [vmem:[%s1401_s2] ss:$0 sm:$0xff] (!%p217_p2) }
   0xb   : > { %v1026_v25 = vpack.c.bf16 (!%p217_p2), %v288_v24, %v287_v23  ;;  %v893_v34 = vld [vmem:[%s1402_s3] ss:$0 sm:$0xff] (!%p217_p2) }
   0xd   : > { %s257_s8 = scalar_select %p256_p3, %s1105_s22, 1  ;;  %1005 = vmatpush3.bf16.msra.mxu0 %v1002_v5  ;;  %1039 = vmatpush3.bf16.msra.mxu1 %v1002_v5 }
   0xe   : > { %s1407_s29 = smov (!%p251_p4, %s887_s29), 15  ;;  %1007 = vmatprep.subr.bf16.mxu0 %v1006_v8  ;;  %1032 = vmatprep.subr.bf16.mxu1 %v1006_v8  ;;  %v1063_v2 = vmov (!%p894_p5), 0.0  }
   0xf   : > { %s906_s13 = sshll.u32 %s257_s8, 5  ;;  %s891_s14 = sshll.u32 %s257_s8, 1  ;;  %436 = vst [vmem:[#allocation2] sm:$0xff] (!%p894_p5), %v1063_v2  ;;  %437 = vst [vmem:[#allocation2 + $0x8] sm:$0xff] (!%p894_p5), %v1063_v2 }
  0x10   : > { %s1133_s17 = scalar_lea.vmem %s1404_s5, %s906_s13  ;;  %s1138_s20 = scalar_lea.vmem %s1405_s6, %s891_s14  ;;  %438 = vst [vmem:[#allocation2 + $0x10] sm:$0xff] (!%p894_p5), %v1063_v2  ;;  %439 = vst [vmem:[#allocation2 + $0x18] sm:$0xff] (!%p894_p5), %v1063_v2 }
  0x11   : > { %s888_s27 = sshll.u32 %s1407_s29, 3  ;;  %1009 = vmatpush3.bf16.msra.mxu0 %v1006_v8  ;;  %1040 = vmatpush3.bf16.msra.mxu1 %v1006_v8  ;;  %440 = vst [vmem:[#allocation2 + $0x20] sm:$0xff] (!%p894_p5), %v1063_v2  ;;  %441 = vst [vmem:[#allocation2 + $0x28] sm:$0xff] (!%p894_p5), %v1063_v2 }
  0x12   : > { %s1149_s7 = scalar_lea.vmem %s1399_s0, %s888_s27  ;;  %1011 = vmatprep.subr.bf16.mxu0 %v1010_v13  ;;  %1033 = vmatprep.subr.bf16.mxu1 %v1010_v13  ;;  %442 = vst [vmem:[#allocation2 + $0x30] sm:$0xff] (!%p894_p5), %v1063_v2  ;;  %443 = vst [vmem:[#allocation2 + $0x38] sm:$0xff] (!%p894_p5), %v1063_v2 }
  0x13   : > { %v265_v11 = vld [vmem:[%s1149_s7] sm:$0xff]  ;;  %v266_v26 = vld [vmem:[%s1149_s7 + $0x8] sm:$0xff]  ;;  %v267_v28 = vld [vmem:[%s1149_s7 + $0x10] sm:$0xff]  ;;  %444 = vst [vmem:[#allocation2 + $0x40] sm:$0xff] (!%p894_p5), %v1063_v2 }
  0x14   : > { %v269_v12 = vld [vmem:[%s1149_s7 + $0x20] sm:$0xff]  ;;  %986 = vmatprep.mubr.f32.mxu0 %v265_v11  ;;  %v270_v27 = vld [vmem:[%s1149_s7 + $0x28] sm:$0xff]  ;;  %v271_v29 = vld [vmem:[%s1149_s7 + $0x30] sm:$0xff]  ;;  %445 = vst [vmem:[#allocation2 + $0x48] sm:$0xff] (!%p894_p5), %v1063_v2 }
  0x15   : > { %992 = vmatprep.mubr.f32.mxu1 %v269_v12  ;;  %1013 = vmatpush3.bf16.msra.mxu0 %v1010_v13  ;;  %v268_v30 = vld [vmem:[%s1149_s7 + $0x18] sm:$0xff]  ;;  %446 = vst [vmem:[#allocation2 + $0x50] sm:$0xff] (!%p894_p5), %v1063_v2  ;;  %447 = vst [vmem:[#allocation2 + $0x58] sm:$0xff] (!%p894_p5), %v1063_v2 }
  0x16   : > { %1041 = vmatpush3.bf16.msra.mxu1 %v1010_v13  ;;  %1015 = vmatprep.subr.bf16.mxu0 %v1014_v16  ;;  %v272_v31 = vld [vmem:[%s1149_s7 + $0x38] sm:$0xff]  ;;  %448 = vst [vmem:[#allocation2 + $0x60] sm:$0xff] (!%p894_p5), %v1063_v2  ;;  %449 = vst [vmem:[#allocation2 + $0x68] sm:$0xff] (!%p894_p5), %v1063_v2 }
  0x17   : > { %1034 = vmatprep.subr.bf16.mxu1 %v1014_v16  ;;  %450 = vst [vmem:[#allocation2 + $0x70] sm:$0xff] (!%p894_p5), %v1063_v2  ;;  %451 = vst [vmem:[#allocation2 + $0x78] sm:$0xff] (!%p894_p5), %v1063_v2 }
  0x18   : > { %452 = vst [vmem:[#allocation2 + $0x80] sm:$0xff] (!%p894_p5), %v1063_v2  ;;  %453 = vst [vmem:[#allocation2 + $0x88] sm:$0xff] (!%p894_p5), %v1063_v2 }
  0x19   : > { %1017 = vmatpush3.bf16.msra.mxu0 %v1014_v16  ;;  %454 = vst [vmem:[#allocation2 + $0x90] sm:$0xff] (!%p894_p5), %v1063_v2  ;;  %455 = vst [vmem:[#allocation2 + $0x98] sm:$0xff] (!%p894_p5), %v1063_v2 }
  0x1a   : > { %1042 = vmatpush3.bf16.msra.mxu1 %v1014_v16  ;;  %1019 = vmatprep.subr.bf16.mxu0 %v1018_v19  ;;  %456 = vst [vmem:[#allocation2 + $0xa0] sm:$0xff] (!%p894_p5), %v1063_v2  ;;  %457 = vst [vmem:[#allocation2 + $0xa8] sm:$0xff] (!%p894_p5), %v1063_v2 }
  0x1b   : > { %1035 = vmatprep.subr.bf16.mxu1 %v1018_v19  ;;  %458 = vst [vmem:[#allocation2 + $0xb0] sm:$0xff] (!%p894_p5), %v1063_v2  ;;  %459 = vst [vmem:[#allocation2 + $0xb8] sm:$0xff] (!%p894_p5), %v1063_v2 }
  0x1c   : > { %460 = vst [vmem:[#allocation2 + $0xc0] sm:$0xff] (!%p894_p5), %v1063_v2  ;;  %461 = vst [vmem:[#allocation2 + $0xc8] sm:$0xff] (!%p894_p5), %v1063_v2 }
  0x1d   : > { %1021 = vmatpush3.bf16.msra.mxu0 %v1018_v19  ;;  %462 = vst [vmem:[#allocation2 + $0xd0] sm:$0xff] (!%p894_p5), %v1063_v2  ;;  %463 = vst [vmem:[#allocation2 + $0xd8] sm:$0xff] (!%p894_p5), %v1063_v2 }
  0x1e   : > { %1043 = vmatpush3.bf16.msra.mxu1 %v1018_v19  ;;  %1023 = vmatprep.subr.bf16.mxu0 %v1022_v22  ;;  %464 = vst [vmem:[#allocation2 + $0xe0] sm:$0xff] (!%p894_p5), %v1063_v2  ;;  %465 = vst [vmem:[#allocation2 + $0xe8] sm:$0xff] (!%p894_p5), %v1063_v2 }
  0x1f   : > { %1036 = vmatprep.subr.bf16.mxu1 %v1022_v22 }
  0x21   : > { %1025 = vmatpush3.bf16.msra.mxu0 %v1022_v22 }
  0x22   : > { %1044 = vmatpush3.bf16.msra.mxu1 %v1022_v22  ;;  %1027 = vmatprep.subr.bf16.mxu0 %v1026_v25 }
  0x23   : > { %1037 = vmatprep.subr.bf16.mxu1 %v1026_v25 }
  0x25   : > { %1029 = vmatpush3.bf16.msra.mxu0 %v1026_v25 }
  0x26   : > { %1045 = vmatpush3.bf16.msra.mxu1 %v1026_v25 }
  0x28   : > { %987 = vmatmul.mubr.f32.vlgmr.msra.gmra.mrb[0].mxu0 %v266_v26 }
  0x29   : > { %993 = vmatmul.mubr.f32.vlgmr.msra.gmra.mrb[0].mxu1 %v270_v27  ;;  %989 = vmatprep.mubr.f32.mxu0 %v267_v28 }
  0x2a   : > { %995 = vmatprep.mubr.f32.mxu1 %v271_v29 }
  0x2c   : > { %990 = vmatmul.mubr.f32.gmra.mrb[2].mxu0 %v268_v30 }
  0x2d   : > { %996 = vmatmul.mubr.f32.gmra.mrb[2].mxu1 %v272_v31 }
  0xfb   : > { %v988_v33 = vpop.f32.mrb[0].mxu0 }
  0xfc   : > { %v994_v35 = vpop.f32.mrb[0].mxu1  ;;  %v402_v36 = vmul.f32 %v988_v33, %v892_v32  ;;  %v355_v38 = vpop.f32.mrb[1].mxu0 }
  0xfd   : > { %v406_v37 = vmul.f32 %v994_v35, %v892_v32  ;;  %v375_v39 = vpop.f32.mrb[1].mxu1  ;;  %v401_v40 = vmul.f32 %v892_v32, %v355_v38 }
  0xfe   : > { %v405_v41 = vmul.f32 %v892_v32, %v375_v39  ;;  %v417_v42 = vadd.f32 %v893_v34, %v402_v36 }
  0xff   : > { %v421_v43 = vadd.f32 %v893_v34, %v406_v37  ;;  %v416_v44 = vadd.f32 %v893_v34, %v401_v40  ;;  %v991_v46 = vpop.f32.mrb[2].mxu0 }
 0x100   : > { %v420_v45 = vadd.f32 %v893_v34, %v405_v41  ;;  %v997_v47 = vpop.f32.mrb[2].mxu1  ;;  %v1189_v48 = vmax.f32 %v417_v42, 0.0  ;;  %v404_v50 = vmul.f32 %v991_v46, %v892_v32  ;;  %v365_v52 = vpop.f32.mrb[3].mxu0  ;;  %435 = sbr.rel (%p894_p5) target bundleno = 263 (0x107), region = 44 }
 0x101   : > { %v1191_v49 = vmax.f32 %v421_v43, 0.0  ;;  %v408_v51 = vmul.f32 %v997_v47, %v892_v32  ;;  %v385_v53 = vpop.f32.mrb[3].mxu1  ;;  %v1193_v54 = vmax.f32 %v416_v44, 0.0  ;;  %v403_v56 = vmul.f32 %v892_v32, %v365_v52 }
 0x102   : > { %v1195_v55 = vmax.f32 %v420_v45, 0.0  ;;  %v407_v57 = vmul.f32 %v892_v32, %v385_v53  ;;  %v419_v58 = vadd.f32 %v893_v34, %v404_v50 }
 0x103   : > { %v423_v59 = vadd.f32 %v893_v34, %v408_v51  ;;  %v418_v60 = vadd.f32 %v893_v34, %v403_v56 }
 0x104   : > { %v422_v61 = vadd.f32 %v893_v34, %v407_v57  ;;  %v1197_v62 = vmax.f32 %v419_v58, 0.0 }
 0x105   : > { %v1199_v63 = vmax.f32 %v423_v59, 0.0  ;;  %v1201_v0 = vmax.f32 %v418_v60, 0.0 }
 0x106   : > { %v1203_v1 = vmax.f32 %v422_v61, 0.0 }
 0x107 PF: > { %467 = vst [vmem:[#allocation2 + $0x20] sm:$0xff] %v1193_v54  ;;  %469 = vst [vmem:[#allocation2 + $0x38] sm:$0xff] %v1189_v48  ;;  %v482_v3 = vld [vmem:[#allocation2 + $0x7] sm:$0xff]  ;;  %v1217_v4 = vld [vmem:[%s1403_s4] ss:$0 sm:$0xff]  ;;  %vm793_vm0 = vcmask 1040384  }
 0x108   : > { %471 = vst [vmem:[#allocation2 + $0x50] sm:$0xff] %v1201_v0  ;;  %473 = vst [vmem:[#allocation2 + $0x68] sm:$0xff] %v1197_v62  ;;  %v511_v5 = vld [vmem:[#allocation2 + $0x8] sm:$0xff]  ;;  %v495_v6 = vmul.f32 %v1217_v4, %v482_v3  ;;  %v896_v7 = vld [vmem:[%s1403_s4 + $0x1] ss:$0 sm:$0xff] }
 0x109   : > { %475 = vst [vmem:[#allocation2 + $0x80] sm:$0xff] %v1195_v55  ;;  %477 = vst [vmem:[#allocation2 + $0x98] sm:$0xff] %v1191_v49  ;;  %v540_v8 = vld [vmem:[#allocation2 + $0x9] sm:$0xff]  ;;  %v1226_v9 = vld [vmem:[%s1403_s4 + $0x2] ss:$0 sm:$0xff]  ;;  %v524_v10 = vmul.f32 %v896_v7, %v511_v5  ;;  %v525_v11 = vmul.f32 %v896_v7, %v1193_v54  ;;  %v526_v14 = vmul.f32 %v896_v7, %v1189_v48 }
 0x10a   : > { %479 = vst [vmem:[#allocation2 + $0xb0] sm:$0xff] %v1203_v1  ;;  %481 = vst [vmem:[#allocation2 + $0xc8] sm:$0xff] %v1199_v63  ;;  %v553_v12 = vmul.f32 %v1226_v9, %v540_v8  ;;  %v1233_v13 = vld [vmem:[%s1403_s4 + $0x4] ss:$0 sm:$0xff]  ;;  %v1245_v17 = vld [vmem:[%s1403_s4 + $0x7] ss:$0 sm:$0xff]  ;;  %v527_v18 = vmul.f32 %v896_v7, %v1201_v0  ;;  %v1278_v27 = vmul.f32 %v896_v7, %v1197_v62 }
 0x10b   : > { %v611_v15 = vmul.f32 %v1233_v13, %v1193_v54  ;;  %v1240_v16 = vmul.f32 %v1233_v13, %v1189_v48  ;;  %v1250_v19 = vmul.f32 %v1233_v13, %v1201_v0  ;;  %v532_v20 = vadd.f32 %v524_v10, %v495_v6  ;;  %v1267_v24 = vld [vmem:[%s1403_s4 + $0x3] ss:$0 sm:$0xff]  ;;  %v1286_v30 = vld [vmem:[%s1403_s4 + $0x5] ss:$0 sm:$0xff]  ;;  %v1291_v31 = vld [vmem:[%s1403_s4 + $0x6] ss:$0 sm:$0xff] }
 0x10c   : > { %v1254_v21 = vmul.f32 %v1245_v17, %v1189_v48  ;;  %v1258_v22 = vmul.f32 %v1245_v17, %v1201_v0  ;;  %v1262_v23 = vmul.f32 %v1233_v13, %v1197_v62  ;;  %v1271_v25 = vmul.f32 %v1245_v17, %v1197_v62  ;;  %v1296_v32 = vld [vmem:[%s1403_s4 + $0x8] ss:$0 sm:$0xff] }
 0x10d   : > { %v1275_v26 = vmul.f32 %v1245_v17, %v1195_v55  ;;  %v1281_v28 = vmul.f32 %v896_v7, %v1195_v55  ;;  %v561_v29 = vadd.f32 %v553_v12, %v532_v20  ;;  %v1300_v33 = vmul.f32 %v1233_v13, %v1195_v55 }
 0x10e   : > { %v1304_v34 = vmul.f32 %v1233_v13, %v1191_v49  ;;  %v1308_v35 = vmul.f32 %v1245_v17, %v1191_v49  ;;  %v483_v36 = vld [vmem:[#allocation2 + $0x1f] sm:$0xff]  ;;  %v570_v38 = vld [vmem:[#allocation2 + $0x37] sm:$0xff]  ;;  %v1312_v39 = vmul.f32 %v1245_v17, %v1203_v1  ;;  %v1315_v40 = vmul.f32 %v896_v7, %v1191_v49 }
 0x10f   : > { %v541_v37 = vld [vmem:[#allocation2 + $0x21] sm:$0xff]  ;;  %v1318_v41 = vmul.f32 %v896_v7, %v1203_v1  ;;  %v1322_v42 = vmul.f32 %v1233_v13, %v1203_v1  ;;  %v496_v43 = vmul.f32 %v1217_v4, %v483_v36  ;;  %v582_v45 = vmul.f32 %v1267_v24, %v483_v36  ;;  %v628_v47 = vld [vmem:[#allocation2 + $0x39] sm:$0xff]  ;;  %v657_v48 = vld [vmem:[#allocation2 + $0x4f] sm:$0xff] }
 0x110   : > { %v554_v44 = vmul.f32 %v1226_v9, %v541_v37  ;;  %v583_v46 = vmul.f32 %v1267_v24, %v570_v38  ;;  %v715_v50 = vld [vmem:[#allocation2 + $0x51] sm:$0xff]  ;;  %v640_v49 = vmul.f32 %v1286_v30, %v541_v37  ;;  %v641_v51 = vmul.f32 %v1286_v30, %v628_v47  ;;  %v572_v62 = vld [vmem:[#allocation2 + $0x67] sm:$0xff] }
 0x111   : > { %v669_v52 = vmul.f32 %v1291_v31, %v570_v38  ;;  %v670_v53 = vmul.f32 %v1291_v31, %v657_v48  ;;  %v533_v54 = vadd.f32 %v525_v11, %v496_v43  ;;  %v590_v55 = vadd.f32 %v582_v45, %v561_v29  ;;  %v630_v5 = vld [vmem:[#allocation2 + $0x69] sm:$0xff]  ;;  %v659_v11 = vld [vmem:[#allocation2 + $0x7f] sm:$0xff] }
 0x112   : > { %v727_v56 = vmul.f32 %v1296_v32, %v628_v47  ;;  %v728_v57 = vmul.f32 %v1296_v32, %v715_v50  ;;  %v497_v58 = vmul.f32 %v1217_v4, %v570_v38  ;;  %v498_v59 = vmul.f32 %v1217_v4, %v657_v48  ;;  %v717_v37 = vld [vmem:[#allocation2 + $0x81] sm:$0xff] }
 0x113   : > { %v555_v60 = vmul.f32 %v1226_v9, %v628_v47  ;;  %v556_v61 = vmul.f32 %v1226_v9, %v715_v50  ;;  %v562_v0 = vadd.f32 %v554_v44, %v533_v54  ;;  %v619_v1 = vadd.f32 %v611_v15, %v590_v55 }
 0x114   : > { %v584_v2 = vmul.f32 %v1267_v24, %v657_v48  ;;  %v585_v3 = vmul.f32 %v1267_v24, %v572_v62  ;;  %v534_v6 = vadd.f32 %v526_v14, %v497_v58  ;;  %v535_v7 = vadd.f32 %v527_v18, %v498_v59 }
 0x115   : > { %v642_v8 = vmul.f32 %v1286_v30, %v715_v50  ;;  %v643_v10 = vmul.f32 %v1286_v30, %v630_v5  ;;  %v591_v12 = vadd.f32 %v583_v46, %v562_v0  ;;  %v648_v20 = vadd.f32 %v640_v49, %v619_v1 }
 0x116   : > { %v671_v29 = vmul.f32 %v1291_v31, %v572_v62  ;;  %v672_v36 = vmul.f32 %v1291_v31, %v659_v11  ;;  %v563_v15 = vadd.f32 %v555_v60, %v534_v6  ;;  %v564_v38 = vadd.f32 %v556_v61, %v535_v7  ;;  %v574_v60 = vld [vmem:[#allocation2 + $0x97] sm:$0xff] }
 0x117   : > { %v729_v43 = vmul.f32 %v1296_v32, %v630_v5  ;;  %v730_v44 = vmul.f32 %v1296_v32, %v717_v37  ;;  %v620_v14 = vadd.f32 %v1240_v16, %v591_v12  ;;  %v677_v18 = vadd.f32 %v669_v52, %v648_v20  ;;  %v661_v12 = vld [vmem:[#allocation2 + $0xaf] sm:$0xff] }
 0x118   : > { %v499_v45 = vmul.f32 %v1217_v4, %v572_v62  ;;  %v500_v47 = vmul.f32 %v1217_v4, %v659_v11  ;;  %v592_v46 = vadd.f32 %v584_v2, %v563_v15  ;;  %v593_v48 = vadd.f32 %v585_v3, %v564_v38 }
 0x119   : > { %v557_v50 = vmul.f32 %v1226_v9, %v630_v5  ;;  %v558_v49 = vmul.f32 %v1226_v9, %v717_v37  ;;  %v649_v54 = vadd.f32 %v641_v51, %v620_v14  ;;  %v706_v55 = vadd.f32 %v1254_v21, %v677_v18  ;;  %v632_v51 = vld [vmem:[#allocation2 + $0x99] sm:$0xff] }
 0x11a   : > { %v536_v58 = vadd.f32 %v1278_v27, %v499_v45  ;;  %v537_v59 = vadd.f32 %v1281_v28, %v500_v47  ;;  %v621_v16 = vadd.f32 %v1250_v19, %v592_v46  ;;  %v622_v52 = vadd.f32 %v1262_v23, %v593_v48 }
 0x11b   : > { %v586_v61 = vmul.f32 %v1267_v24, %v659_v11  ;;  %v587_v62 = vmul.f32 %v1267_v24, %v574_v60  ;;  %v678_v0 = vadd.f32 %v670_v53, %v649_v54  ;;  %v735_v1 = vadd.f32 %v727_v56, %v706_v55 }
 0x11c   : > { %v565_v2 = vadd.f32 %v557_v50, %v536_v58  ;;  %v566_v3 = vadd.f32 %v558_v49, %v537_v59  ;;  %v650_v5 = vadd.f32 %v642_v8, %v621_v16  ;;  %v651_v21 = vadd.f32 %v643_v10, %v622_v52 }
 0x11d   : > { %v644_v27 = vmul.f32 %v1286_v30, %v717_v37  ;;  %v645_v28 = vmul.f32 %v1286_v30, %v632_v51  ;;  %v707_v6 = vadd.f32 %v1258_v22, %v678_v0  ;;  %v772_v19 = vmul.f32 %v735_v1, %v735_v1  ;;  %v719_v37 = vld [vmem:[#allocation2 + $0xb1] sm:$0xff] }
 0x11e   : > { %v594_v7 = vadd.f32 %v586_v61, %v565_v2  ;;  %v595_v23 = vadd.f32 %v587_v62, %v566_v3  ;;  %v679_v11 = vadd.f32 %v671_v29, %v650_v5  ;;  %v680_v20 = vadd.f32 %v672_v36, %v651_v21 }
 0x11f   : > { %v673_v53 = vmul.f32 %v1291_v31, %v574_v60  ;;  %v674_v56 = vmul.f32 %v1291_v31, %v661_v12  ;;  %v736_v15 = vadd.f32 %v728_v57, %v707_v6  ;;  %v731_v38 = vmul.f32 %v1296_v32, %v632_v51 }
 0x120   : > { %v623_v8 = vadd.f32 %v1300_v33, %v594_v7  ;;  %v624_v10 = vadd.f32 %v1304_v34, %v595_v23  ;;  %v708_v22 = vadd.f32 %v1271_v25, %v679_v11  ;;  %v709_v14 = vadd.f32 %v1275_v26, %v680_v20 }
 0x121   : > { %v732_v29 = vmul.f32 %v1296_v32, %v719_v37  ;;  %v501_v36 = vmul.f32 %v1217_v4, %v574_v60  ;;  %v910_v18 = vpack.c.bf16 %v736_v15, %v735_v1  ;;  %v759_v45 = vadd.f32 %v736_v15, %v735_v1  ;;  %v576_v60 = vld [vmem:[#allocation2 + $0xc7] sm:$0xff] }
 0x122   : > { %v773_v47 = vmul.f32 %v736_v15, %v736_v15  ;;  %v652_v57 = vadd.f32 %v644_v27, %v623_v8  ;;  %v737_v46 = vadd.f32 %v729_v43, %v708_v22  ;;  %v738_v33 = vadd.f32 %v730_v44, %v709_v14  ;;  %v721_v15 = vld [vmem:[#allocation2 + $0xe1] sm:$0xff] }
 0x123   : > { %v653_v48 = vadd.f32 %v645_v28, %v624_v10  ;;  %v502_v34 = vmul.f32 %v1217_v4, %v661_v12  ;;  %911 = vst [vmem:[%s1133_s17] sm:$0xff] %v910_v18   ;;  %v538_v25 = vadd.f32 %v1315_v40, %v501_v36  ;;  %v559_v26 = vmul.f32 %v1226_v9, %v632_v51  ;;  %v634_v51 = vld [vmem:[#allocation2 + $0xc9] sm:$0xff]  ;;  %v663_v28 = vld [vmem:[#allocation2 + $0xdf] sm:$0xff] }
 0x124   : > { %v780_v50 = vadd.f32 %v773_v47, %v772_v19  ;;  %v681_v49 = vadd.f32 %v673_v53, %v652_v57  ;;  %v915_v54 = vpack.c.bf16 %v738_v33, %v737_v46  ;;  %v760_v55 = vadd.f32 %v759_v45, %v737_v46 }
 0x125   : > { %v774_v58 = vmul.f32 %v737_v46, %v737_v46  ;;  %v775_v59 = vmul.f32 %v738_v33, %v738_v33  ;;  %v682_v16 = vadd.f32 %v674_v56, %v653_v48  ;;  %v539_v44 = vadd.f32 %v1318_v41, %v502_v34 }
 0x126   : > { %v710_v43 = vadd.f32 %v1308_v35, %v681_v49  ;;  %v560_v52 = vmul.f32 %v1226_v9, %v719_v37  ;;  %927 = vst [vmem:[%s1133_s17 + $0x8] sm:$0xff] %v915_v54   ;;  %v761_v4 = vadd.f32 %v760_v55, %v738_v33  ;;  %v567_v62 = vadd.f32 %v559_v26, %v538_v25 }
 0x127   : > { %v781_v61 = vadd.f32 %v780_v50, %v774_v58  ;;  %v588_v40 = vmul.f32 %v1267_v24, %v661_v12  ;;  %v711_v0 = vadd.f32 %v1312_v39, %v682_v16  ;;  %v589_v3 = vmul.f32 %v1267_v24, %v576_v60  ;;  %v692_v12 = vld [vmem:[#allocation2 + $0xe0] sm:$0xff] }
 0x128   : > { %v739_v1 = vadd.f32 %v731_v38, %v710_v43  ;;  %v568_v2 = vadd.f32 %v560_v52, %v539_v44  ;;  %v618_v35 = vmul.f32 %v1233_v13, %v1199_v63  ;;  %v646_v41 = vmul.f32 %v1286_v30, %v719_v37 }
 0x129   : > { %v596_v5 = vadd.f32 %v588_v40, %v567_v62  ;;  %v782_v9 = vadd.f32 %v781_v61, %v775_v59  ;;  %v740_v21 = vadd.f32 %v732_v29, %v711_v0  ;;  %v647_v39 = vmul.f32 %v1286_v30, %v634_v51 }
 0x12a   : > { %v597_v27 = vadd.f32 %v589_v3, %v568_v2  ;;  %v675_v19 = vmul.f32 %v1291_v31, %v576_v60  ;;  %v762_v24 = vadd.f32 %v761_v4, %v739_v1  ;;  %v776_v23 = vmul.f32 %v739_v1, %v739_v1 }
 0x12b   : > { %v625_v6 = vadd.f32 %v1322_v42, %v596_v5  ;;  %v920_v7 = vpack.c.bf16 %v740_v21, %v739_v1  ;;  %v676_v13 = vmul.f32 %v1291_v31, %v663_v28  ;;  %v704_v53 = vmul.f32 %v1245_v17, %v1199_v63 }
 0x12c   : > { %v626_v11 = vadd.f32 %v618_v35, %v597_v27  ;;  %v783_v56 = vadd.f32 %v782_v9, %v776_v23  ;;  %v705_v30 = vmul.f32 %v1245_v17, %v692_v12  ;;  %v733_v10 = vmul.f32 %v1296_v32, %v634_v51 }
 0x12d   : > { %v654_v20 = vadd.f32 %v646_v41, %v625_v6  ;;  %928 = vst [vmem:[%s1133_s17 + $0x10] sm:$0xff] %v920_v7   ;;  %v763_v37 = vadd.f32 %v762_v24, %v740_v21  ;;  %v777_v38 = vmul.f32 %v740_v21, %v740_v21  ;;  %v734_v29 = vmul.f32 %v1296_v32, %v721_v15 }
 0x12e   : > { %v655_v8 = vadd.f32 %v647_v39, %v626_v11 }
 0x12f   : > { %v683_v42 = vadd.f32 %v675_v19, %v654_v20  ;;  %v784_v31 = vadd.f32 %v783_v56, %v777_v38 }
 0x130   : > { %v684_v22 = vadd.f32 %v676_v13, %v655_v8 }
 0x131   : > { %v712_v14 = vadd.f32 %v704_v53, %v683_v42 }
 0x132   : > { %v713_v36 = vadd.f32 %v705_v30, %v684_v22 }
 0x133   : > { %v741_v18 = vadd.f32 %v733_v10, %v712_v14 }
 0x134   : > { %v742_v63 = vadd.f32 %v734_v29, %v713_v36 }
 0x135   : > { %v764_v45 = vadd.f32 %v763_v37, %v741_v18  ;;  %v778_v47 = vmul.f32 %v741_v18, %v741_v18 }
 0x136   : > { %v925_v57 = vpack.c.bf16 %v742_v63, %v741_v18  ;;  %v779_v33 = vmul.f32 %v742_v63, %v742_v63 }
 0x137   : > { %v765_v46 = vadd.f32 %v764_v45, %v742_v63  ;;  %v785_v48 = vadd.f32 %v784_v31, %v778_v47 }
 0x138   : > { %929 = vst [vmem:[%s1133_s17 + $0x18] sm:$0xff] %v925_v57  }
 0x139   : > { %v766_v17 = vrot.slane %v765_v46, 4  ;;  %v786_v34 = vadd.f32 %v785_v48, %v779_v33 }
 0x13b   : > { %v767_v50 = vadd.f32 %v766_v17, %v765_v46  ;;  %v787_v49 = vrot.slane %v786_v34, 4 }
 0x13d   : > { %v768_v25 = vrot.slane %v767_v50, 2  ;;  %v788_v26 = vadd.f32 %v787_v49, %v786_v34 }
 0x13f   : > { %v769_v54 = vadd.f32 %v768_v25, %v767_v50  ;;  %v789_v32 = vrot.slane %v788_v26, 2 }
 0x141   : > { %v770_v55 = vrot.slane %v769_v54, 1  ;;  %v790_v58 = vadd.f32 %v789_v32, %v788_v26 }
 0x143   : > { %v791_v59 = vrot.slane %v790_v58, 1  ;;  %v771_v60 = vadd.f32 %v770_v55, %v769_v54 }
 0x145   : > { %v792_v16 = vadd.f32 %v791_v59, %v790_v58 }
 0x147   : > { %v794_v43 = vsel %vm793_vm0, %v771_v60, %v792_v16 }
 0x148   : > { %795 = vst [vmem:[%s1138_s20] sm:$0x3] %v794_v43 }
 0x149 PF: > { %s17_s21 = sadd.s32 1, %s1061_s21  }
 0x14a   : > { %p14_p6 = scmp.ge.s32.totalorder %s17_s21, 4  }
 0x14c   :  { %16 = sbr.rel (!%p14_p6) target bundleno = 1 (0x1), region = 94 }

// kernel: bottleneck_pallas.7
= control target key start
LH: loop header
LB: loop body
LE: loop exit
PB: predicated region body
PF: predicated region fallthrough
CT: control target
= control target key end

     0   :  { %s1091_s24 = smov 0   ;;  %s1093_s25 = smov 0   ;;  %s1259_s0 = inlined_call_operand.vmem [shape: bf16[128,128], index: 0, kind: input, shape index: {}]   ;;  %s1260_s1 = inlined_call_operand.vmem [shape: f32[128,128], index: 1, kind: input, shape index: {}]   ;;  %s1261_s2 = inlined_call_operand.vmem [shape: f32[1,128], index: 2, kind: input, shape index: {}]   ;;  %s1262_s3 = inlined_call_operand.vmem [shape: f32[1,128], index: 3, kind: input, shape index: {}]   ;;  %s1263_s4 = inlined_call_operand.vmem [shape: f32[128,128], index: 4, kind: input, shape index: {}]   ;;  %s1264_s5 = inlined_call_operand.vmem [shape: f32[1,128], index: 5, kind: input, shape index: {}]   ;;  %s1265_s6 = inlined_call_operand.vmem [shape: f32[1,128], index: 6, kind: input, shape index: {}]   ;;  %s1266_s7 = inlined_call_operand.vmem [shape: f32[128,128], index: 7, kind: output, shape index: {}]  }
   0x1   :  { %s1095_s26 = smov 0  }
   0x2 LB: > { %s1104_s27 = sadd.s32 4294967295, %s1014_s26   ;;  %s1106_s28 = sadd.s32 1, %s1014_s26   ;;  %s1014_s26 = sphi %s1095_s26, %s1270_s26   ;;  %s1010_s25 = sphi %s1093_s25, %s1269_s25   ;;  %s1006_s24 = sphi %s1091_s24, %s1268_s24  }
   0x3   : > { %s178_s29 = ssub.s32 %s1014_s26, %s1106_s28  ;;  %s181_s30 = sadd.s32 1, %s1010_s25 }
   0x4   : > { %p179_p0 = scmp.eq.s32.totalorder %s178_s29, 0  ;;  %p191_p1 = scmp.ne.s32.totalorder %s1010_s25, %s1006_s24 }
   0x5   : > { %p192_p2 = scmp.eq.s32.totalorder %s1104_s27, 5  ;;  %p739_p3 = scmp.ge.s32.totalorder %s1014_s26, 1 }
   0x6   : > { %s1114_s8 = scalar_select %p179_p0, %s1010_s25, %s181_s30  }
   0x7   : > { %p1116_p4 = por %p192_p2, %p191_p1  ;;  %p265_p5 = scmp.lt.s32.totalorder %s1014_s26, 7 }
   0x9   : > { %p266_p6 = pnand %p739_p3, %p265_p5 }
   0xa   : > { %v371_v0 = vld [vmem:[%s1263_s4] sm:$0xff] (!%p266_p6)  ;;  %v372_v1 = vld [vmem:[%s1263_s4 + $0x8] sm:$0xff] (!%p266_p6)  ;;  %v373_v2 = vld [vmem:[%s1263_s4 + $0x10] sm:$0xff] (!%p266_p6)  ;;  %v1048_v3 = vmov (!%p266_p6), 0.0|0.0   ;;  %s1135_s18 = smul.u32 (!%p266_p6), 3, %s1104_s27  ;;  %vm1049_vm0 = vmmov (!%p266_p6), 0  }
   0xb   : > { %269 = sbr.rel (%p266_p6) target bundleno = 330 (0x14a), region = 48  ;;  %847 = vmatprep.subr.bf16.mxu1 (!%p266_p6), %v1048_v3  ;;  %v824_v4 = vpack.c.bf16 (!%p266_p6), %v372_v1, %v371_v0  ;;  %823 = vmatprep.subr.bf16.mxu0 (!%p266_p6), %v1048_v3  ;;  %v374_v5 = vld [vmem:[%s1263_s4 + $0x18] sm:$0xff] (!%p266_p6)  ;;  %v1050_v6 = vmov (!%p266_p6), 0.0   ;;  %v375_v8 = vld [vmem:[%s1263_s4 + $0x20] sm:$0xff] (!%p266_p6)  ;;  %v376_v9 = vld [vmem:[%s1263_s4 + $0x28] sm:$0xff] (!%p266_p6)  ;;  %s306_s29 = sand.u32 (!%p266_p6), 1, %s1006_s24  }
   0xc   : > { %817 = vmatprep.mubr.msk.f32.mxu1 (!%p266_p6), %vm1049_vm0, %v1050_v6  ;;  %814 = vmatprep.mubr.msk.f32.mxu0 (!%p266_p6), %vm1049_vm0, %v1050_v6  ;;  %v827_v7 = vpack.c.bf16 (!%p266_p6), %v374_v5, %v373_v2  ;;  %p314_p7 = scmp.lt.s32.totalorder (!%p266_p6), %s1135_s18, 15  ;;  %v830_v10 = vpack.c.bf16 (!%p266_p6), %v376_v9, %v375_v8  ;;  %v377_v11 = vld [vmem:[%s1263_s4 + $0x30] sm:$0xff] (!%p266_p6)  ;;  %v378_v12 = vld [vmem:[%s1263_s4 + $0x38] sm:$0xff] (!%p266_p6)  ;;  %v379_v14 = vld [vmem:[%s1263_s4 + $0x40] sm:$0xff] (!%p266_p6) }
   0xd   : > { %855 = vmatpush3.bf16.msra.mxu1 (!%p266_p6), %v824_v4  ;;  %825 = vmatpush3.bf16.msra.mxu0 (!%p266_p6), %v824_v4  ;;  %v833_v13 = vpack.c.bf16 (!%p266_p6), %v378_v12, %v377_v11  ;;  %v380_v15 = vld [vmem:[%s1263_s4 + $0x48] sm:$0xff] (!%p266_p6)  ;;  %v381_v18 = vld [vmem:[%s1263_s4 + $0x50] sm:$0xff] (!%p266_p6)  ;;  %v382_v19 = vld [vmem:[%s1263_s4 + $0x58] sm:$0xff] (!%p266_p6) }
   0xe   : > { %848 = vmatprep.subr.bf16.mxu1 (!%p266_p6), %v1048_v3  ;;  %826 = vmatprep.subr.bf16.mxu0 (!%p266_p6), %v1048_v3  ;;  %v836_v16 = vpack.c.bf16 (!%p266_p6), %v380_v15, %v379_v14  ;;  %v839_v22 = vpack.c.bf16 (!%p266_p6), %v382_v19, %v381_v18  ;;  %v742_v23 = vld [vmem:[%s1261_s2] ss:$0 sm:$0xff] (!%p266_p6)  ;;  %v384_v26 = vld [vmem:[%s1263_s4 + $0x68] sm:$0xff] (!%p266_p6)  ;;  %v385_v32 = vld [vmem:[%s1263_s4 + $0x70] sm:$0xff] (!%p266_p6) }
   0xf   : > { %v383_v25 = vld [vmem:[%s1263_s4 + $0x60] sm:$0xff] (!%p266_p6)  ;;  %v386_v33 = vld [vmem:[%s1263_s4 + $0x78] sm:$0xff] (!%p266_p6) }
  0x10   : > { %v842_v30 = vpack.c.bf16 (!%p266_p6), %v384_v26, %v383_v25  ;;  %v743_v31 = vld [vmem:[%s1262_s3] ss:$0 sm:$0xff] (!%p266_p6)  ;;  %v845_v37 = vpack.c.bf16 (!%p266_p6), %v386_v33, %v385_v32 }
  0x11   : > { %856 = vmatpush3.bf16.msra.mxu1 (!%p266_p6), %v827_v7  ;;  %828 = vmatpush3.bf16.msra.mxu0 (!%p266_p6), %v827_v7  ;;  %v744_v42 = vld [vmem:[%s1264_s5] ss:$0 sm:$0xff] (!%p266_p6) }
  0x12   : > { %s1151_s23 = scalar_select %p314_p7, %s1135_s18, 15  ;;  %849 = vmatprep.subr.bf16.mxu1 %v1048_v3  ;;  %829 = vmatprep.subr.bf16.mxu0 %v1048_v3  ;;  %v745_v44 = vld [vmem:[%s1265_s6] ss:$0 sm:$0xff] }
  0x13   : > { %s507_s14 = ssub.s32 (%p1116_p4), 16, %s1135_s18  ;;  %s758_s15 = smul.u32 (%p1116_p4), 24, %s1104_s27 }
  0x14   : > { %s740_s11 = sshll.u32 %s1151_s23, 2  ;;  %s741_s21 = sshll.u32 %s1151_s23, 3 }
  0x15   : > { %857 = vmatpush3.bf16.msra.mxu1 %v830_v10  ;;  %831 = vmatpush3.bf16.msra.mxu0 %v830_v10  ;;  %s317_s19 = scalar_lea.vmem %s1259_s0, %s740_s11  ;;  %s331_s11 = scalar_lea.vmem %s1260_s1, %s741_s21 }
  0x16   : > { %850 = vmatprep.subr.bf16.mxu1 %v1048_v3  ;;  %832 = vmatprep.subr.bf16.mxu0 %v1048_v3  ;;  %v760_v17 = vld [vmem:[%s317_s19] sm:$0xff]   ;;  %v344_v24 = vld [vmem:[%s317_s19 + $0x8] sm:$0xf]  ;;  %s863_s23 = smul.u32 24, %s306_s29  ;;  %v489_v59 = vld [vmem:[%s331_s11 + $0x10] sm:$0xff]  ;;  %p508_p8 = scmp.lt.s32.totalorder (%p1116_p4), %s507_s14, 3 }
  0x17   : > { %v762_v20 = vunpack.c.h.bf16 %v760_v17  ;;  %v761_v21 = vunpack.c.l.bf16 %v760_v17  ;;  %v347_v29 = vunpack.c.l.bf16 %v344_v24  ;;  %v488_v50 = vld [vmem:[%s331_s11 + $0x8] sm:$0xff]  ;;  %v487_v51 = vld [vmem:[%s331_s11] sm:$0xff]  ;;  %s1230_s19 = scalar_lea.vmem (%p1116_p4), %s1266_s7, %s758_s15  }
  0x18   : > { %s1218_s24 = scalar_lea.vmem [#allocation2], %s863_s23  }
  0x19   : > { %858 = vmatpush3.bf16.msra.mxu1 %v833_v13  ;;  %834 = vmatpush3.bf16.msra.mxu0 %v833_v13  ;;  %v356_v27 = vmul.f32 %v762_v20, %v742_v23  ;;  %v355_v28 = vmul.f32 %v761_v21, %v742_v23  ;;  %v357_v36 = vmul.f32 %v742_v23, %v347_v29 }
  0x1a   : > { %851 = vmatprep.subr.bf16.mxu1 %v1048_v3  ;;  %835 = vmatprep.subr.bf16.mxu0 %v1048_v3 }
  0x1b   : > { %v366_v34 = vadd.f32 %v743_v31, %v356_v27  ;;  %v365_v35 = vadd.f32 %v743_v31, %v355_v28  ;;  %v367_v40 = vadd.f32 %v743_v31, %v357_v36 }
  0x1d   : > { %859 = vmatpush3.bf16.msra.mxu1 %v836_v16  ;;  %837 = vmatpush3.bf16.msra.mxu0 %v836_v16  ;;  %v369_v38 = vmax.f32 %v366_v34, 0.0  ;;  %v368_v39 = vmax.f32 %v365_v35, 0.0  ;;  %v370_v41 = vmax.f32 %v367_v40, 0.0 }
  0x1e   : > { %852 = vmatprep.subr.bf16.mxu1 %v1048_v3  ;;  %838 = vmatprep.subr.bf16.mxu0 %v1048_v3 }
  0x21   : > { %860 = vmatpush3.bf16.msra.mxu1 %v839_v22  ;;  %840 = vmatpush3.bf16.msra.mxu0 %v839_v22 }
  0x22   : > { %853 = vmatprep.subr.bf16.mxu1 %v1048_v3  ;;  %841 = vmatprep.subr.bf16.mxu0 %v1048_v3 }
  0x25   : > { %861 = vmatpush3.bf16.msra.mxu1 %v842_v30  ;;  %843 = vmatpush3.bf16.msra.mxu0 %v842_v30 }
  0x26   : > { %854 = vmatprep.subr.bf16.mxu1 %v1048_v3  ;;  %844 = vmatprep.subr.bf16.mxu0 %v1048_v3 }
  0x29   : > { %862 = vmatpush3.bf16.msra.mxu1 %v845_v37  ;;  %846 = vmatpush3.bf16.msra.mxu0 %v845_v37 }
  0x2c   : > { %818 = vmatmul.mubr.f32.vlgmr.msra.gmra.mrb[0].mxu1 %v369_v38  ;;  %815 = vmatmul.mubr.f32.vlgmr.msra.gmra.mrb[0].mxu0 %v368_v39 }
  0x2d   : > { %820 = vmatprep.mubr.msk.f32.mxu1 %vm1049_vm0, %v1050_v6 }
  0x30   : > { %821 = vmatmul.mubr.f32.gmra.mrb[2].mxu1 %v370_v41 }
  0xff   : > { %v458_v43 = vpop.f32.mrb[0].mxu1  ;;  %v453_v45 = vpop.f32.mrb[0].mxu0 }
 0x100   : > { %v475_v46 = vmul.f32 %v744_v42, %v458_v43  ;;  %v819_v47 = vpop.f32.mrb[1].mxu1  ;;  %v474_v48 = vmul.f32 %v744_v42, %v453_v45  ;;  %v816_v49 = vpop.f32.mrb[1].mxu0 }
 0x102   : > { %v485_v52 = vadd.f32 %v745_v44, %v475_v46  ;;  %v484_v53 = vadd.f32 %v745_v44, %v474_v48 }
 0x103   : > { %v463_v54 = vpop.f32.mrb[2].mxu1 }
 0x104   : > { %v491_v55 = vadd.f32 %v488_v50, %v485_v52  ;;  %v490_v56 = vadd.f32 %v487_v51, %v484_v53  ;;  %v476_v57 = vmul.f32 %v744_v42, %v463_v54  ;;  %v822_v58 = vpop.f32.mrb[3].mxu1 }
 0x106   : > { %v494_v60 = vmax.f32 %v491_v55, 0.0  ;;  %v493_v61 = vmax.f32 %v490_v56, 0.0  ;;  %v486_v62 = vadd.f32 %v745_v44, %v476_v57  ;;  %505 = sbr.rel (!%p1116_p4) target bundleno = 330 (0x14a), region = 52 }
 0x108   : > { %497 = vst [vmem:[%s1218_s24 + $0x8] sm:$0xff] %v494_v60  ;;  %496 = vst [vmem:[%s1218_s24] sm:$0xff] %v493_v61  ;;  %v492_v63 = vadd.f32 %v489_v59, %v486_v62 }
 0x10a   : > { %v495_v0 = vmax.f32 %v492_v63, 0.0 }
 0x10c   : > { %498 = vst [vmem:[%s1218_s24 + $0x10] sm:$0xff] %v495_v0 }
 0x10d   : > { %s1272_s14 = smov (!%p508_p8, %s507_s14), 3 }
 0x10e   : > { %s746_s20 = sshll.u32 %s1272_s14, 7 }
 0x10f   : > { %p749_p9 = scmp.eq.s32.totalorder %s746_s20, 0 }
 0x110   : > { %956 = sdivrem.u32 (!%p749_p9), %s1272_s14, 3 }
 0x111   : > { %516 = sbr.rel (%p749_p9) target bundleno = 330 (0x14a), region = 56 }
 0x119   : > { %s1236_s9 = spop.drf %956 }
 0x11a   : > { %p750_p10 = scmp.le.s32.totalorder %s1236_s9, 0 }
 0x11b   : > { %s1016_s27 = smov (!%p750_p10), %s1230_s19   ;;  %s1020_s18 = smov (!%p750_p10), %s1218_s24  }
 0x11c   : > { %686 = sbr.rel (%p750_p10) target bundleno = 301 (0x12d), region = 135  ;;  %s1024_s21 = smov (!%p750_p10), 0  }
 0x11d   : > { %s1028_s22 = smov (!%p750_p10), 0  }
 0x123 LB: >> { %v584_v1 = vld [vmem:[%s1022_s18] sm:$0xff]  ;;  %v586_v2 = vld [vmem:[%s1022_s18 + $0x8] sm:$0xff]  ;;  %v588_v3 = vld [vmem:[%s1022_s18 + $0x10] sm:$0xff]  ;;  %s590_s26 = sadd.s32 1, %s1026_s21  ;;  %s578_s22 = sadd.s32 1, %s1030_s22   ;;  %s1030_s22 = sphi %s1028_s22, %s578_s22   ;;  %s1026_s21 = sphi %s1024_s21, %s1025_s21   ;;  %s1022_s18 = sphi %s1020_s18, %s595_s18   ;;  %s1018_s27 = sphi %s1016_s27, %s596_s27  }
 0x124   : >> { %585 = vst [vmem:[%s1018_s27] sm:$0xff] %v584_v1  ;;  %587 = vst [vmem:[%s1018_s27 + $0x8] sm:$0xff] %v586_v2  ;;  %p591_p11 = scmp.ge.s32.totalorder %s590_s26, %s1236_s9  ;;  %p577_p12 = scmp.ge.s32.totalorder %s578_s22, %s1236_s9 }
 0x125   : >> { %589 = vst [vmem:[%s1018_s27 + $0x10] sm:$0xff] %v588_v3 }
 0x126   : >> { %s1274_s26 = smov (%p591_p11, %s590_s26), 0  ;;  %580 = sbr.rel (!%p577_p12) target bundleno = 291 (0x123), region = 141 }
 0x127   : >> { %s593_s29 = smul.u32 24, %s1274_s26  ;;  %s1025_s21 = smov %s1274_s26  }
 0x129   : >> { %s595_s18 = scalar_lea.vmem %s1218_s24, %s593_s29 [#allocation2]   ;;  %s596_s27 = scalar_lea.vmem %s1230_s19, %s593_s29  }
 0x12d PF: > { %958 = sdivrem.u32 %s1272_s14, 3 }
 0x12e   : > { %s751_s30 = smul.u32 24, %s1236_s9 }
 0x130   : > { %s601_s10 = scalar_lea.vmem %s1218_s24, %s751_s30 [#allocation2]   ;;  %s603_s11 = scalar_lea.vmem %s1230_s19, %s751_s30  }
 0x136   : > { %s959_s12 = spop.drf %958 }
 0x137   : > { %p753_p13 = scmp.le.s32.totalorder %s959_s12, 0 }
 0x138   : > { %s1032_s13 = smov (!%p753_p13), %s603_s11   ;;  %s1036_s23 = smov (!%p753_p13), %s601_s10  }
 0x139   : > { %700 = sbr.rel (%p753_p13) target bundleno = 330 (0x14a), region = 146  ;;  %s1040_s15 = smov (!%p753_p13), 0  }
 0x13a   : > { %s1044_s16 = smov (!%p753_p13), 0  }
 0x140 LB: >> { %v613_v4 = vld [vmem:[%s1038_s23] sm:$0xff]  ;;  %s615_s17 = sadd.s32 1, %s1042_s15  ;;  %s607_s16 = sadd.s32 1, %s1046_s16   ;;  %s1046_s16 = sphi %s1044_s16, %s607_s16   ;;  %s1042_s15 = sphi %s1040_s15, %s1041_s15   ;;  %s1038_s23 = sphi %s1036_s23, %s620_s23   ;;  %s1034_s13 = sphi %s1032_s13, %s621_s13  }
 0x141   : >> { %614 = vst [vmem:[%s1034_s13] sm:$0xff] %v613_v4  ;;  %p616_p0 = scmp.ge.s32.totalorder %s615_s17, %s959_s12  ;;  %p606_p1 = scmp.ge.s32.totalorder %s607_s16, %s959_s12 }
 0x143   : >> { %s1276_s17 = smov (%p616_p0, %s615_s17), 0  ;;  %609 = sbr.rel (!%p606_p1) target bundleno = 320 (0x140), region = 152 }
 0x144   : >> { %s754_s24 = sshll.u32 %s1276_s17, 3  ;;  %s1041_s15 = smov %s1276_s17  }
 0x145   : >> { %s620_s23 = scalar_lea.vmem %s601_s10, %s754_s24 [#allocation2]   ;;  %s621_s13 = scalar_lea.vmem %s603_s11, %s754_s24  }
 0x14a PF: > { %p14_p2 = scmp.ge.s32.totalorder %s1106_s28, 8   ;;  %s1268_s24 = smov %s1010_s25 }
 0x14b   : > { %s1269_s25 = smov %s1114_s8  ;;  %s1270_s26 = smov %s1106_s28 }
 0x14c   :  { %16 = sbr.rel (!%p14_p2) target bundleno = 2 (0x2), region = 163 }

// kernel: bottleneck_pallas.6
= control target key start
LH: loop header
LB: loop body
LE: loop exit
PB: predicated region body
PF: predicated region fallthrough
CT: control target
= control target key end

     0   :  { %s571_s15 = smov 0   ;;  %s679_s0 = inlined_call_operand.vmem [shape: bf16[128,128], index: 0, kind: input, shape index: {}]   ;;  %s680_s1 = inlined_call_operand.vmem [shape: f32[1,128], index: 1, kind: input, shape index: {}]   ;;  %s681_s2 = inlined_call_operand.vmem [shape: f32[1,128], index: 2, kind: input, shape index: {}]   ;;  %s682_s3 = inlined_call_operand.vmem [shape: f32[128,128], index: 3, kind: input, shape index: {}]   ;;  %s683_s4 = inlined_call_operand.vmem [shape: f32[2,128], index: 4, kind: output, shape index: {}]  }
   0x1 LB: > { %s577_s16 = sadd.s32 4294967295, %s540_s15   ;;  %p411_p0 = scmp.ge.s32.totalorder %s540_s15, 1  ;;  %s540_s15 = sphi %s571_s15, %s14_s15  }
   0x2   : > { %p166_p1 = scmp.lt.s32.totalorder %s540_s15, 7 }
   0x4   : > { %p167_p2 = pnand %p411_p0, %p166_p1 }
   0x5   : > { %s191_s17 = smul.u32 (!%p167_p2), 3, %s577_s16  ;;  %p413_p4 = scmp.ne.s32.totalorder (!%p167_p2), %s577_s16, 0 }
   0x6   : > { %170 = sbr.rel (%p167_p2) target bundleno = 291 (0x123), region = 36 }
   0x7   : > { %p196_p3 = scmp.lt.s32.totalorder (!%p167_p2), %s191_s17, 15 }
   0xd   : > { %s685_s17 = smov (!%p196_p3, %s191_s17), 15  ;;  %208 = sbr.rel (%p413_p4) target bundleno = 20 (0x14), region = 40 }
   0xe   : > { %s412_s18 = sshll.u32 %s685_s17, 2  ;;  %v542_v0 = vmov (!%p413_p4), 0.0  }
   0xf   : > { %s585_s21 = scalar_lea.vmem %s679_s0, %s412_s18  ;;  %209 = vst [vmem:[%s683_s4] sm:$0x3] (!%p413_p4), %v542_v0 }
  0x14 PF: > { %v239_v1 = vld [vmem:[%s682_s3] sm:$0xff]  ;;  %v240_v2 = vld [vmem:[%s682_s3 + $0x8] sm:$0xff]  ;;  %v241_v3 = vld [vmem:[%s682_s3 + $0x10] sm:$0xff]  ;;  %v543_v4 = vmov 0.0|0.0   ;;  %vm544_vm0 = vmmov 0   ;;  %v545_v7 = vmov 0.0   ;;  %v335_v43 = vlaneseq }
  0x15   : > { %482 = vmatprep.subr.bf16.mxu0 %v543_v4  ;;  %506 = vmatprep.subr.bf16.mxu1 %v543_v4  ;;  %v483_v5 = vpack.c.bf16 %v240_v2, %v239_v1  ;;  %v242_v6 = vld [vmem:[%s682_s3 + $0x18] sm:$0xff]  ;;  %v243_v9 = vld [vmem:[%s682_s3 + $0x20] sm:$0xff]  ;;  %v244_v10 = vld [vmem:[%s682_s3 + $0x28] sm:$0xff]  ;;  %s339_s10 = smul.u32 24, %s577_s16  ;;  %vm376_vm4 = vcmask 1040384  }
  0x16   : > { %473 = vmatprep.mubr.msk.f32.mxu0 %vm544_vm0, %v545_v7  ;;  %476 = vmatprep.mubr.msk.f32.mxu1 %vm544_vm0, %v545_v7  ;;  %v486_v8 = vpack.c.bf16 %v242_v6, %v241_v3  ;;  %v489_v11 = vpack.c.bf16 %v244_v10, %v243_v9  ;;  %v245_v12 = vld [vmem:[%s682_s3 + $0x30] sm:$0xff]  ;;  %v246_v13 = vld [vmem:[%s682_s3 + $0x38] sm:$0xff]  ;;  %v247_v15 = vld [vmem:[%s682_s3 + $0x40] sm:$0xff]  ;;  %v336_v44 = vshrl.u32 %v335_v43, 7 }
  0x17   : > { %484 = vmatpush3.bf16.msra.mxu0 %v483_v5  ;;  %514 = vmatpush3.bf16.msra.mxu1 %v483_v5  ;;  %v492_v14 = vpack.c.bf16 %v246_v13, %v245_v12  ;;  %v248_v16 = vld [vmem:[%s682_s3 + $0x48] sm:$0xff]  ;;  %v419_v18 = vld [vmem:[%s585_s21] sm:$0xff]   ;;  %v249_v19 = vld [vmem:[%s682_s3 + $0x50] sm:$0xff]  ;;  %v340_v46 = vstv %s339_s10 }
  0x18   : > { %485 = vmatprep.subr.bf16.mxu0 %v543_v4  ;;  %507 = vmatprep.subr.bf16.mxu1 %v543_v4  ;;  %v495_v17 = vpack.c.bf16 %v248_v16, %v247_v15  ;;  %v250_v20 = vld [vmem:[%s682_s3 + $0x58] sm:$0xff]  ;;  %v420_v21 = vunpack.c.l.bf16 %v419_v18  ;;  %v421_v22 = vunpack.c.h.bf16 %v419_v18  ;;  %v414_v24 = vld [vmem:[%s680_s1] ss:$0 sm:$0xff]  ;;  %v212_v25 = vld [vmem:[%s585_s21 + $0x8] sm:$0xf]  ;;  %v337_v45 = vadd.s32 8, %v336_v44 }
  0x19   : > { %v498_v23 = vpack.c.bf16 %v250_v20, %v249_v19  ;;  %v251_v26 = vld [vmem:[%s682_s3 + $0x60] sm:$0xff]  ;;  %v252_v27 = vld [vmem:[%s682_s3 + $0x68] sm:$0xff]  ;;  %v215_v30 = vunpack.c.l.bf16 %v212_v25  ;;  %v253_v33 = vld [vmem:[%s682_s3 + $0x70] sm:$0xff]  ;;  %v341_v47 = vadd.s32 %v340_v46, %v336_v44  ;;  %v338_v49 = vadd.s32 16, %v336_v44 }
  0x1a   : > { %v223_v28 = vmul.f32 %v420_v21, %v414_v24  ;;  %v224_v29 = vmul.f32 %v421_v22, %v414_v24  ;;  %v501_v31 = vpack.c.bf16 %v252_v27, %v251_v26  ;;  %v415_v32 = vld [vmem:[%s681_s2] ss:$0 sm:$0xff]  ;;  %v254_v34 = vld [vmem:[%s682_s3 + $0x78] sm:$0xff]  ;;  %v342_v48 = vadd.s32 %v340_v46, %v337_v45 }
  0x1b   : > { %487 = vmatpush3.bf16.msra.mxu0 %v486_v8  ;;  %515 = vmatpush3.bf16.msra.mxu1 %v486_v8  ;;  %v225_v37 = vmul.f32 %v414_v24, %v215_v30  ;;  %v504_v38 = vpack.c.bf16 %v254_v34, %v253_v33  ;;  %vm344_vm1 = vcmp.lt.s32.totalorder %v341_v47, 128  ;;  %v343_v50 = vadd.s32 %v340_v46, %v338_v49  ;;  %v375_v15 = vld [vmem:[%s683_s4] sm:$0x3] }
  0x1c   : > { %488 = vmatprep.subr.bf16.mxu0 %v543_v4  ;;  %508 = vmatprep.subr.bf16.mxu1 %v543_v4  ;;  %v233_v35 = vadd.f32 %v415_v32, %v223_v28  ;;  %v234_v36 = vadd.f32 %v415_v32, %v224_v29  ;;  %vm345_vm2 = vcmp.lt.s32.totalorder %v342_v48, 128 }
  0x1d   : > { %v235_v41 = vadd.f32 %v415_v32, %v225_v37  ;;  %vm346_vm3 = vcmp.lt.s32.totalorder %v343_v50, 128 }
  0x1e   : > { %v236_v39 = vmax.f32 %v233_v35, 0.0  ;;  %v237_v40 = vmax.f32 %v234_v36, 0.0 }
  0x1f   : > { %490 = vmatpush3.bf16.msra.mxu0 %v489_v11  ;;  %516 = vmatpush3.bf16.msra.mxu1 %v489_v11  ;;  %v238_v42 = vmax.f32 %v235_v41, 0.0 }
  0x20   : > { %491 = vmatprep.subr.bf16.mxu0 %v543_v4  ;;  %509 = vmatprep.subr.bf16.mxu1 %v543_v4 }
  0x23   : > { %493 = vmatpush3.bf16.msra.mxu0 %v492_v14  ;;  %517 = vmatpush3.bf16.msra.mxu1 %v492_v14 }
  0x24   : > { %494 = vmatprep.subr.bf16.mxu0 %v543_v4  ;;  %510 = vmatprep.subr.bf16.mxu1 %v543_v4 }
  0x27   : > { %496 = vmatpush3.bf16.msra.mxu0 %v495_v17  ;;  %518 = vmatpush3.bf16.msra.mxu1 %v495_v17 }
  0x28   : > { %497 = vmatprep.subr.bf16.mxu0 %v543_v4  ;;  %511 = vmatprep.subr.bf16.mxu1 %v543_v4 }
  0x2b   : > { %499 = vmatpush3.bf16.msra.mxu0 %v498_v23  ;;  %519 = vmatpush3.bf16.msra.mxu1 %v498_v23 }
  0x2c   : > { %500 = vmatprep.subr.bf16.mxu0 %v543_v4  ;;  %512 = vmatprep.subr.bf16.mxu1 %v543_v4 }
  0x2f   : > { %502 = vmatpush3.bf16.msra.mxu0 %v501_v31  ;;  %520 = vmatpush3.bf16.msra.mxu1 %v501_v31 }
  0x30   : > { %503 = vmatprep.subr.bf16.mxu0 %v543_v4  ;;  %513 = vmatprep.subr.bf16.mxu1 %v543_v4 }
  0x33   : > { %505 = vmatpush3.bf16.msra.mxu0 %v504_v38  ;;  %521 = vmatpush3.bf16.msra.mxu1 %v504_v38 }
  0x36   : > { %474 = vmatmul.mubr.f32.vlgmr.msra.gmra.mrb[0].mxu0 %v236_v39  ;;  %477 = vmatmul.mubr.f32.vlgmr.msra.gmra.mrb[0].mxu1 %v237_v40 }
  0x37   : > { %479 = vmatprep.mubr.msk.f32.mxu1 %vm544_vm0, %v545_v7 }
  0x3a   : > { %480 = vmatmul.mubr.f32.gmra.mrb[2].mxu1 %v238_v42 }
 0x109   : > { %v321_v51 = vpop.f32.mrb[0].mxu0  ;;  %v326_v52 = vpop.f32.mrb[0].mxu1 }
 0x10a   : > { %v353_v53 = vsel %vm344_vm1, %v321_v51, 0.0  ;;  %v354_v54 = vsel %vm345_vm2, %v326_v52, 0.0  ;;  %v478_v55 = vpop.f32.mrb[1].mxu1  ;;  %v475_v56 = vpop.f32.mrb[1].mxu0 }
 0x10b   : > { %v364_v57 = vmul.f32 %v353_v53, %v353_v53  ;;  %v356_v58 = vadd.f32 %v354_v54, %v353_v53  ;;  %v365_v59 = vmul.f32 %v354_v54, %v354_v54 }
 0x10d   : > { %v367_v60 = vadd.f32 %v365_v59, %v364_v57  ;;  %v331_v61 = vpop.f32.mrb[2].mxu1 }
 0x10e   : > { %v355_v62 = vsel %vm346_vm3, %v331_v61, 0.0  ;;  %v481_v63 = vpop.f32.mrb[3].mxu1 }
 0x10f   : > { %v357_v0 = vadd.f32 %v356_v58, %v355_v62  ;;  %v366_v1 = vmul.f32 %v355_v62, %v355_v62 }
 0x111   : > { %v358_v2 = vrot.slane %v357_v0, 4  ;;  %v368_v3 = vadd.f32 %v367_v60, %v366_v1 }
 0x113   : > { %v359_v4 = vadd.f32 %v358_v2, %v357_v0  ;;  %v369_v5 = vrot.slane %v368_v3, 4 }
 0x115   : > { %v360_v6 = vrot.slane %v359_v4, 2  ;;  %v370_v7 = vadd.f32 %v369_v5, %v368_v3 }
 0x117   : > { %v361_v8 = vadd.f32 %v360_v6, %v359_v4  ;;  %v371_v9 = vrot.slane %v370_v7, 2 }
 0x119   : > { %v362_v10 = vrot.slane %v361_v8, 1  ;;  %v372_v11 = vadd.f32 %v371_v9, %v370_v7 }
 0x11b   : > { %v373_v12 = vrot.slane %v372_v11, 1  ;;  %v363_v13 = vadd.f32 %v362_v10, %v361_v8 }
 0x11d   : > { %v374_v14 = vadd.f32 %v373_v12, %v372_v11 }
 0x11f   : > { %v377_v16 = vsel %vm376_vm4, %v363_v13, %v374_v14 }
 0x120   : > { %v378_v17 = vadd.f32 %v377_v16, %v375_v15 }
 0x122   : > { %379 = vst [vmem:[%s683_s4] sm:$0x3] %v378_v17 }
 0x123 PF: > { %s14_s15 = sadd.s32 1, %s540_s15  }
 0x124   : > { %p11_p5 = scmp.ge.s32.totalorder %s14_s15, 8  }
 0x126   :  { %13 = sbr.rel (!%p11_p5) target bundleno = 1 (0x1), region = 66 }

</bundles_post_ra>
